<compile_context>
chip_gen: v5e
topology: v5e:2x2
jax: 0.10.0
libtpu: 0.0.40
codegen_flags: <defaults>
</compile_context>

<pallas_src>
import functools
import math

import jax
import jax.numpy as jnp
from jax.experimental import pallas as pl
from jax.experimental.pallas import tpu as pltpu


def _layernorm(x, w, b, eps=1e-5):
    # x: (N, C), w/b: (1, C).  Matches torch.nn.LayerNorm (biased variance).
    mean = jnp.mean(x, axis=-1, keepdims=True)
    xc = x - mean
    var = jnp.mean(xc * xc, axis=-1, keepdims=True)
    inv = jax.lax.rsqrt(var + eps)
    return xc * inv * w + b


def _gelu_exact(x):
    # nn.GELU default: exact erf-based GELU (kept exact for semantic fidelity).
    return 0.5 * x * (1.0 + jax.lax.erf(x * (1.0 / math.sqrt(2.0))))


def block_kernel(
    x_ref,                      # (1, N, C)  f32
    ln1_w_ref, ln1_b_ref,       # (1, C)     f32
    qkv_w_ref,                  # (C, 3C)    bf16
    proj_w_ref,                 # (nh, d, C) bf16  (proj weight pre-split per head)
    proj_b_ref,                 # (1, C)     f32
    ln2_w_ref, ln2_b_ref,       # (1, C)     f32
    fc1_w_ref, fc1_b_ref,       # (C, H) bf16, (1, H) f32
    fc2_w_ref, fc2_b_ref,       # (H, C) bf16, (1, C) f32
    out_ref,                    # (1, N, C)  f32
    *, num_heads, head_dim, scale,
):
    x = x_ref[0]                                   # (N, C) f32
    N = x.shape[0]
    C = num_heads * head_dim

    # ---- Attention branch -------------------------------------------------
    h = _layernorm(x, ln1_w_ref[...], ln1_b_ref[...])
    h_bf = h.astype(jnp.bfloat16)
    # One big (N,C)x(C,3C) bf16 matmul with f32 accumulation (MXU-optimal shape).
    qkv = jnp.dot(h_bf, qkv_w_ref[...], preferred_element_type=jnp.float32)   # (N, 3C)

    # Fold the attention scale into q once (N*C muls, not N*N per head).
    q_all = qkv[:, 0 * C:1 * C] * scale
    k_all = qkv[:, 1 * C:2 * C]
    v_all = qkv[:, 2 * C:3 * C]

    # concat_h(o_h) @ W_proj == sum_h o_h @ W_proj[h*d:(h+1)*d, :]
    # -> accumulate each head directly into the projected output.  Removes the
    # (N, C) concatenate and keeps only a single (N, C) f32 accumulator live
    # across heads.  proj_w_ref[hd] is a static leading-axis index (aligned).
    acc = jnp.zeros((N, C), jnp.float32)
    for hd in range(num_heads):
        sl = slice(hd * head_dim, (hd + 1) * head_dim)
        qh = q_all[:, sl].astype(jnp.bfloat16)                      # (N, d)
        kh = k_all[:, sl].astype(jnp.bfloat16)                      # (N, d)
        vh = v_all[:, sl].astype(jnp.bfloat16)                      # (N, d)
        # q @ k^T without materializing the transpose: contract last dims.
        att = jax.lax.dot_general(
            qh, kh, dimension_numbers=(((1,), (1,)), ((), ())),
            preferred_element_type=jnp.float32)                     # (N, N) f32
        att = att - jnp.max(att, axis=-1, keepdims=True)
        p = jnp.exp(att)
        p = p * pl.reciprocal(jnp.sum(p, axis=-1, keepdims=True), approx=True)
        oh = jnp.dot(p.astype(jnp.bfloat16), vh,
                     preferred_element_type=jnp.float32)            # (N, d)
        acc = acc + jnp.dot(oh.astype(jnp.bfloat16), proj_w_ref[hd],
                            preferred_element_type=jnp.float32)     # (N, C)
    x1 = x + acc + proj_b_ref[...]                                  # residual 1 (f32)

    # ---- MLP branch --------------------------------------------------------
    h2 = _layernorm(x1, ln2_w_ref[...], ln2_b_ref[...])
    h2 = jnp.dot(h2.astype(jnp.bfloat16), fc1_w_ref[...],
                 preferred_element_type=jnp.float32) + fc1_b_ref[...]
    h2 = _gelu_exact(h2)
    h2 = jnp.dot(h2.astype(jnp.bfloat16), fc2_w_ref[...],
                 preferred_element_type=jnp.float32) + fc2_b_ref[...]

    out_ref[0] = x1 + h2                                            # residual 2 (f32)


def _run_block(x, args, *, num_heads, head_dim, scale, H, single_buffer_weights):
    B, N, C = x.shape

    def const_spec(shape):
        idx = lambda b, _n=len(shape): (0,) * _n
        if single_buffer_weights:
            # Weight/bias blocks are identical for every grid step -> a single
            # buffer halves their resident VMEM footprint.
            return pl.BlockSpec(shape, idx, pipeline_mode=pl.Buffered(1))
        return pl.BlockSpec(shape, idx)

    # ---- VMEM budget (bytes) ----
    w_bytes = 2 * (3 * C * C + C * C + C * H + H * C)          # bf16 weights
    w_bytes *= 1 if single_buffer_weights else 2               # buffering factor
    io_bytes = 2 * 2 * N * C * 4                               # x/out tiles, double-buffered
    act_bytes = 4 * (3 * N * C + 2 * N * N + N * H + 4 * N * C)  # f32 live activations (rough)
    vmem_limit = min(max(int(1.25 * (w_bytes + io_bytes + act_bytes)),
                         32 * 1024 * 1024),
                     64 * 1024 * 1024)                         # cap at v7x physical VMEM

    # ---- Cost estimate for XLA scheduling around the custom call ----
    flops = 2 * B * N * C * (4 * C + 2 * H) + 4 * B * N * N * C
    transcendentals = B * num_heads * N * N + B * N * H + 2 * B * N
    bytes_accessed = 2 * B * N * C * 4 + w_bytes + 4 * (6 * C + 2 * H)

    kernel = functools.partial(
        block_kernel, num_heads=num_heads, head_dim=head_dim, scale=scale)

    fn = pl.pallas_call(
        kernel,
        out_shape=jax.ShapeDtypeStruct((B, N, C), jnp.float32),
        grid_spec=pltpu.PrefetchScalarGridSpec(
            num_scalar_prefetch=0,
            grid=(B,),
            in_specs=[
                pl.BlockSpec((1, N, C), lambda b: (b, 0, 0)),   # x
                const_spec((1, C)), const_spec((1, C)),         # ln1 w, b
                const_spec((C, 3 * C)),                         # qkv weight (bf16)
                const_spec((num_heads, head_dim, C)),           # proj weight (bf16, per-head)
                const_spec((1, C)),                             # proj bias
                const_spec((1, C)), const_spec((1, C)),         # ln2 w, b
                const_spec((C, H)), const_spec((1, H)),         # fc1 w, b
                const_spec((H, C)), const_spec((1, C)),         # fc2 w, b
            ],
            out_specs=pl.BlockSpec((1, N, C), lambda b: (b, 0, 0)),
        ),
        compiler_params=pltpu.CompilerParams(
            # Batch axis is fully independent -> "parallel" lets v7x shard it
            # across both TensorCores; harmless on single-TC v5e/v6e.
            dimension_semantics=("parallel",),
            vmem_limit_bytes=vmem_limit,
        ),
        cost_estimate=pl.CostEstimate(
            flops=flops, transcendentals=transcendentals,
            bytes_accessed=bytes_accessed),
    )
    return fn(x, *args)


def vit_block_forward(x, params, *, num_heads):
    B, N, C = x.shape
    assert C % num_heads == 0, "channel dim must be divisible by num_heads"
    head_dim = C // num_heads
    scale = head_dim ** (-0.5)
    H = params["fc1_w"].shape[1]

    # bf16 weights: MXU-native on v5e/v6e/v7x and halves resident weight VMEM
    # (what makes ViT-B-scale weights fit v7x's 64 MiB VMEM).  LayerNorm params,
    # biases, residuals and all accumulations stay f32.
    qkv_w = params["qkv_w"].astype(jnp.bfloat16)
    proj_w = params["proj_w"].reshape(num_heads, head_dim, C).astype(jnp.bfloat16)
    fc1_w = params["fc1_w"].astype(jnp.bfloat16)
    fc2_w = params["fc2_w"].astype(jnp.bfloat16)

    args = (
        params["ln1_w"], params["ln1_b"],
        qkv_w, proj_w, params["proj_b"],
        params["ln2_w"], params["ln2_b"],
        fc1_w, params["fc1_b"],
        fc2_w, params["fc2_b"],
    )
    kw = dict(num_heads=num_heads, head_dim=head_dim, scale=scale, H=H)
    try:
        out = _run_block(x, args, single_buffer_weights=True, **kw)
        return jax.block_until_ready(out)   # surface any deferred errors here
    except Exception:
        # pl.Buffered(1) / pipeline_mode not supported by this jax build ->
        # fall back to default double-buffered weight blocks (same semantics).
        return _run_block(x, args, single_buffer_weights=False, **kw)


def make_params(key, dim, mlp_ratio=4.0):
    H = int(dim * mlp_ratio)
    ks = jax.random.split(key, 6)
    s = 0.02
    return {
        "ln1_w": jnp.ones((1, dim), jnp.float32),
        "ln1_b": jnp.zeros((1, dim), jnp.float32),
        "qkv_w": s * jax.random.normal(ks[0], (dim, 3 * dim), jnp.float32),
        "proj_w": s * jax.random.normal(ks[1], (dim, dim), jnp.float32),
        "proj_b": s * jax.random.normal(ks[2], (1, dim), jnp.float32),
        "ln2_w": jnp.ones((1, dim), jnp.float32),
        "ln2_b": jnp.zeros((1, dim), jnp.float32),
        "fc1_w": s * jax.random.normal(ks[3], (dim, H), jnp.float32),
        "fc1_b": jnp.zeros((1, H), jnp.float32),
        "fc2_w": s * jax.random.normal(ks[4], (H, dim), jnp.float32),
        "fc2_b": jnp.zeros((1, dim), jnp.float32),
    }


def reference_forward(x, p, *, num_heads):
    # Pure-JAX f32 reference of the same (non-quantized) Block forward.
    B, N, C = x.shape
    hd = C // num_heads
    scale = hd ** (-0.5)

    def ln(v, w, b):
        m = v.mean(-1, keepdims=True)
        var = ((v - m) ** 2).mean(-1, keepdims=True)
        return (v - m) / jnp.sqrt(var + 1e-5) * w[0] + b[0]

    h = ln(x, p["ln1_w"], p["ln1_b"])
    qkv = h @ p["qkv_w"]
    qkv = qkv.reshape(B, N, 3, num_heads, hd).transpose(2, 0, 3, 1, 4)
    q, k, v = qkv[0], qkv[1], qkv[2]
    att = jnp.einsum("bhqd,bhkd->bhqk", q, k) * scale
    att = jax.nn.softmax(att, axis=-1)
    o = jnp.einsum("bhqk,bhkd->bhqd", att, v).transpose(0, 2, 1, 3).reshape(B, N, C)
    x1 = x + (o @ p["proj_w"] + p["proj_b"][0])
    h2 = ln(x1, p["ln2_w"], p["ln2_b"])
    h2 = h2 @ p["fc1_w"] + p["fc1_b"][0]
    h2 = jax.nn.gelu(h2, approximate=False)
    h2 = h2 @ p["fc2_w"] + p["fc2_b"][0]
    return x1 + h2


if __name__ == "__main__":
    B, N, C = 2, 8, 32
    num_heads = 4

    key = jax.random.PRNGKey(0)
    kx, kp = jax.random.split(key)
    x = jax.random.normal(kx, (B, N, C), jnp.float32)
    params = make_params(kp, C)

    out = vit_block_forward(x, params, num_heads=num_heads)
    out = jax.block_until_ready(out)

    ref = reference_forward(x, params, num_heads=num_heads)
    assert out.shape == (B, N, C)
    err = float(jnp.max(jnp.abs(out - ref)))
    # bf16 matmul inputs with f32 accumulation -> expect ~1e-3-level deviation
    # from the pure-f32 reference.
    assert err < 2e-2, err
    print("KERNEL_OK")
</pallas_src>

<mosaic_0001>
module attributes {stable_mosaic.version = 11 : i64} {
  func.func @block_kernel(%arg0: i32, %arg1: memref<1x8x32xf32, #tpu.memory_space<vmem>>, %arg2: memref<1x32xf32, #tpu.memory_space<vmem>>, %arg3: memref<1x32xf32, #tpu.memory_space<vmem>>, %arg4: memref<32x96xbf16, #tpu.memory_space<vmem>>, %arg5: memref<4x8x32xbf16, #tpu.memory_space<vmem>>, %arg6: memref<1x32xf32, #tpu.memory_space<vmem>>, %arg7: memref<1x32xf32, #tpu.memory_space<vmem>>, %arg8: memref<1x32xf32, #tpu.memory_space<vmem>>, %arg9: memref<32x128xbf16, #tpu.memory_space<vmem>>, %arg10: memref<1x128xf32, #tpu.memory_space<vmem>>, %arg11: memref<128x32xbf16, #tpu.memory_space<vmem>>, %arg12: memref<1x32xf32, #tpu.memory_space<vmem>>, %arg13: memref<1x8x32xf32, #tpu.memory_space<vmem>>) attributes {dimension_semantics = [#tpu.dimension_semantics<parallel>], iteration_bounds = array<i64: 2>, scalar_prefetch = 0 : i64, scratch_operands = 0 : i64, tpu.core_type = #tpu.core_type<tc>, window_params = [{transform_indices = @transform_0, window_bounds = array<i64: 1, 8, 32>}, {pipeline_mode = #tpu.pipeline_mode<synchronous>, transform_indices = @transform_1, window_bounds = array<i64: 1, 32>}, {pipeline_mode = #tpu.pipeline_mode<synchronous>, transform_indices = @transform_2, window_bounds = array<i64: 1, 32>}, {pipeline_mode = #tpu.pipeline_mode<synchronous>, transform_indices = @transform_3, window_bounds = array<i64: 32, 96>}, {pipeline_mode = #tpu.pipeline_mode<synchronous>, transform_indices = @transform_4, window_bounds = array<i64: 4, 8, 32>}, {pipeline_mode = #tpu.pipeline_mode<synchronous>, transform_indices = @transform_5, window_bounds = array<i64: 1, 32>}, {pipeline_mode = #tpu.pipeline_mode<synchronous>, transform_indices = @transform_6, window_bounds = array<i64: 1, 32>}, {pipeline_mode = #tpu.pipeline_mode<synchronous>, transform_indices = @transform_7, window_bounds = array<i64: 1, 32>}, {pipeline_mode = #tpu.pipeline_mode<synchronous>, transform_indices = @transform_8, window_bounds = array<i64: 32, 128>}, {pipeline_mode = #tpu.pipeline_mode<synchronous>, transform_indices = @transform_9, window_bounds = array<i64: 1, 128>}, {pipeline_mode = #tpu.pipeline_mode<synchronous>, transform_indices = @transform_10, window_bounds = array<i64: 128, 32>}, {pipeline_mode = #tpu.pipeline_mode<synchronous>, transform_indices = @transform_11, window_bounds = array<i64: 1, 32>}, {transform_indices = @transform_12, window_bounds = array<i64: 1, 8, 32>}]} {
    %c0 = arith.constant 0 : index
    %c0_0 = arith.constant 0 : index
    %c0_1 = arith.constant 0 : index
    %0 = vector.load %arg1[%c0, %c0_0, %c0_1] : memref<1x8x32xf32, #tpu.memory_space<vmem>>, vector<1x8x32xf32>
    %1 = vector.shape_cast %0 : vector<1x8x32xf32> to vector<8x32xf32>
    %c0_2 = arith.constant 0 : index
    %c0_3 = arith.constant 0 : index
    %2 = vector.load %arg2[%c0_2, %c0_3] : memref<1x32xf32, #tpu.memory_space<vmem>>, vector<1x32xf32>
    %c0_4 = arith.constant 0 : index
    %c0_5 = arith.constant 0 : index
    %3 = vector.load %arg3[%c0_4, %c0_5] : memref<1x32xf32, #tpu.memory_space<vmem>>, vector<1x32xf32>
    %cst = arith.constant dense<0.000000e+00> : vector<8xf32>
    %4 = vector.multi_reduction <add>, %1, %cst [1] : vector<8x32xf32> to vector<8xf32>
    %5 = vector.shape_cast %4 : vector<8xf32> to vector<8x1xf32>
    %cst_6 = arith.constant 3.200000e+01 : f32
    %6 = vector.broadcast %cst_6 : f32 to vector<8x1xf32>
    %7 = arith.divf %5, %6 : vector<8x1xf32>
    %8 = vector.broadcast %7 : vector<8x1xf32> to vector<8x32xf32>
    %9 = arith.subf %1, %8 : vector<8x32xf32>
    %10 = arith.mulf %9, %9 : vector<8x32xf32>
    %cst_7 = arith.constant dense<0.000000e+00> : vector<8xf32>
    %11 = vector.multi_reduction <add>, %10, %cst_7 [1] : vector<8x32xf32> to vector<8xf32>
    %12 = vector.shape_cast %11 : vector<8xf32> to vector<8x1xf32>
    %cst_8 = arith.constant 3.200000e+01 : f32
    %13 = vector.broadcast %cst_8 : f32 to vector<8x1xf32>
    %14 = arith.divf %12, %13 : vector<8x1xf32>
    %cst_9 = arith.constant 9.99999974E-6 : f32
    %15 = vector.broadcast %cst_9 : f32 to vector<8x1xf32>
    %16 = arith.addf %14, %15 : vector<8x1xf32>
    %17 = math.rsqrt %16 : vector<8x1xf32>
    %18 = vector.broadcast %17 : vector<8x1xf32> to vector<8x32xf32>
    %19 = arith.mulf %9, %18 : vector<8x32xf32>
    %20 = vector.broadcast %2 : vector<1x32xf32> to vector<8x32xf32>
    %21 = arith.mulf %19, %20 : vector<8x32xf32>
    %22 = vector.broadcast %3 : vector<1x32xf32> to vector<8x32xf32>
    %23 = arith.addf %21, %22 : vector<8x32xf32>
    %24 = arith.truncf %23 : vector<8x32xf32> to vector<8x32xbf16>
    %c0_10 = arith.constant 0 : index
    %c0_11 = arith.constant 0 : index
    %25 = vector.load %arg4[%c0_10, %c0_11] : memref<32x96xbf16, #tpu.memory_space<vmem>>, vector<32x96xbf16>
    %cst_12 = arith.constant dense<0.000000e+00> : vector<8x96xf32>
    %26 = tpu.matmul %24, %25, %cst_12 {dimension_numbers = #tpu.dot_dimension_numbers<[1], [0], [0], [1], [0, 0, 1, 1], [], []>} : vector<8x32xbf16>, vector<32x96xbf16>, vector<8x96xf32> -> vector<8x96xf32>
    %27 = vector.extract_strided_slice %26 {offsets = [0, 0], sizes = [8, 32], strides = [1, 1]} : vector<8x96xf32> to vector<8x32xf32>
    %cst_13 = arith.constant 0.353553385 : f32
    %28 = vector.broadcast %cst_13 : f32 to vector<8x32xf32>
    %29 = arith.mulf %27, %28 : vector<8x32xf32>
    %30 = vector.extract_strided_slice %26 {offsets = [0, 32], sizes = [8, 32], strides = [1, 1]} : vector<8x96xf32> to vector<8x32xf32>
    %31 = vector.extract_strided_slice %26 {offsets = [0, 64], sizes = [8, 32], strides = [1, 1]} : vector<8x96xf32> to vector<8x32xf32>
    %cst_14 = arith.constant 0.000000e+00 : f32
    %32 = vector.broadcast %cst_14 : f32 to vector<8x32xf32>
    %33 = vector.extract_strided_slice %29 {offsets = [0, 0], sizes = [8, 8], strides = [1, 1]} : vector<8x32xf32> to vector<8x8xf32>
    %34 = arith.truncf %33 : vector<8x8xf32> to vector<8x8xbf16>
    %35 = vector.extract_strided_slice %30 {offsets = [0, 0], sizes = [8, 8], strides = [1, 1]} : vector<8x32xf32> to vector<8x8xf32>
    %36 = arith.truncf %35 : vector<8x8xf32> to vector<8x8xbf16>
    %37 = vector.extract_strided_slice %31 {offsets = [0, 0], sizes = [8, 8], strides = [1, 1]} : vector<8x32xf32> to vector<8x8xf32>
    %38 = arith.truncf %37 : vector<8x8xf32> to vector<8x8xbf16>
    %cst_15 = arith.constant dense<0.000000e+00> : vector<8x8xf32>
    %39 = tpu.matmul %34, %36, %cst_15 {dimension_numbers = #tpu.dot_dimension_numbers<[1], [1], [0], [0], [0, 0, 1, 0], [], []>} : vector<8x8xbf16>, vector<8x8xbf16>, vector<8x8xf32> -> vector<8x8xf32>
    %cst_16 = arith.constant dense<0xFF800000> : vector<8xf32>
    %40 = vector.multi_reduction <maximumf>, %39, %cst_16 [1] : vector<8x8xf32> to vector<8xf32>
    %41 = vector.shape_cast %40 : vector<8xf32> to vector<8x1xf32>
    %42 = vector.broadcast %41 : vector<8x1xf32> to vector<8x8xf32>
    %43 = arith.subf %39, %42 : vector<8x8xf32>
    %44 = math.exp %43 : vector<8x8xf32>
    %cst_17 = arith.constant dense<0.000000e+00> : vector<8xf32>
    %45 = vector.multi_reduction <add>, %44, %cst_17 [1] : vector<8x8xf32> to vector<8xf32>
    %46 = vector.shape_cast %45 : vector<8xf32> to vector<8x1xf32>
    %47 = tpu.reciprocal %46 {approx = true} : vector<8x1xf32> -> vector<8x1xf32>
    %48 = vector.broadcast %47 : vector<8x1xf32> to vector<8x8xf32>
    %49 = arith.mulf %44, %48 : vector<8x8xf32>
    %50 = arith.truncf %49 : vector<8x8xf32> to vector<8x8xbf16>
    %cst_18 = arith.constant dense<0.000000e+00> : vector<8x8xf32>
    %51 = tpu.matmul %50, %38, %cst_18 {dimension_numbers = #tpu.dot_dimension_numbers<[1], [0], [0], [1], [0, 0, 1, 1], [], []>} : vector<8x8xbf16>, vector<8x8xbf16>, vector<8x8xf32> -> vector<8x8xf32>
    %52 = arith.truncf %51 : vector<8x8xf32> to vector<8x8xbf16>
    %c0_19 = arith.constant 0 : index
    %c0_20 = arith.constant 0 : index
    %c0_21 = arith.constant 0 : index
    %53 = vector.load %arg5[%c0_19, %c0_20, %c0_21] : memref<4x8x32xbf16, #tpu.memory_space<vmem>>, vector<1x8x32xbf16>
    %54 = vector.shape_cast %53 : vector<1x8x32xbf16> to vector<8x32xbf16>
    %cst_22 = arith.constant dense<0.000000e+00> : vector<8x32xf32>
    %55 = tpu.matmul %52, %54, %cst_22 {dimension_numbers = #tpu.dot_dimension_numbers<[1], [0], [0], [1], [0, 0, 1, 1], [], []>} : vector<8x8xbf16>, vector<8x32xbf16>, vector<8x32xf32> -> vector<8x32xf32>
    %56 = arith.addf %32, %55 : vector<8x32xf32>
    %57 = vector.extract_strided_slice %29 {offsets = [0, 8], sizes = [8, 8], strides = [1, 1]} : vector<8x32xf32> to vector<8x8xf32>
    %58 = arith.truncf %57 : vector<8x8xf32> to vector<8x8xbf16>
    %59 = vector.extract_strided_slice %30 {offsets = [0, 8], sizes = [8, 8], strides = [1, 1]} : vector<8x32xf32> to vector<8x8xf32>
    %60 = arith.truncf %59 : vector<8x8xf32> to vector<8x8xbf16>
    %61 = vector.extract_strided_slice %31 {offsets = [0, 8], sizes = [8, 8], strides = [1, 1]} : vector<8x32xf32> to vector<8x8xf32>
    %62 = arith.truncf %61 : vector<8x8xf32> to vector<8x8xbf16>
    %cst_23 = arith.constant dense<0.000000e+00> : vector<8x8xf32>
    %63 = tpu.matmul %58, %60, %cst_23 {dimension_numbers = #tpu.dot_dimension_numbers<[1], [1], [0], [0], [0, 0, 1, 0], [], []>} : vector<8x8xbf16>, vector<8x8xbf16>, vector<8x8xf32> -> vector<8x8xf32>
    %cst_24 = arith.constant dense<0xFF800000> : vector<8xf32>
    %64 = vector.multi_reduction <maximumf>, %63, %cst_24 [1] : vector<8x8xf32> to vector<8xf32>
    %65 = vector.shape_cast %64 : vector<8xf32> to vector<8x1xf32>
    %66 = vector.broadcast %65 : vector<8x1xf32> to vector<8x8xf32>
    %67 = arith.subf %63, %66 : vector<8x8xf32>
    %68 = math.exp %67 : vector<8x8xf32>
    %cst_25 = arith.constant dense<0.000000e+00> : vector<8xf32>
    %69 = vector.multi_reduction <add>, %68, %cst_25 [1] : vector<8x8xf32> to vector<8xf32>
    %70 = vector.shape_cast %69 : vector<8xf32> to vector<8x1xf32>
    %71 = tpu.reciprocal %70 {approx = true} : vector<8x1xf32> -> vector<8x1xf32>
    %72 = vector.broadcast %71 : vector<8x1xf32> to vector<8x8xf32>
    %73 = arith.mulf %68, %72 : vector<8x8xf32>
    %74 = arith.truncf %73 : vector<8x8xf32> to vector<8x8xbf16>
    %cst_26 = arith.constant dense<0.000000e+00> : vector<8x8xf32>
    %75 = tpu.matmul %74, %62, %cst_26 {dimension_numbers = #tpu.dot_dimension_numbers<[1], [0], [0], [1], [0, 0, 1, 1], [], []>} : vector<8x8xbf16>, vector<8x8xbf16>, vector<8x8xf32> -> vector<8x8xf32>
    %76 = arith.truncf %75 : vector<8x8xf32> to vector<8x8xbf16>
    %c1 = arith.constant 1 : index
    %c0_27 = arith.constant 0 : index
    %c0_28 = arith.constant 0 : index
    %77 = vector.load %arg5[%c1, %c0_27, %c0_28] : memref<4x8x32xbf16, #tpu.memory_space<vmem>>, vector<1x8x32xbf16>
    %78 = vector.shape_cast %77 : vector<1x8x32xbf16> to vector<8x32xbf16>
    %cst_29 = arith.constant dense<0.000000e+00> : vector<8x32xf32>
    %79 = tpu.matmul %76, %78, %cst_29 {dimension_numbers = #tpu.dot_dimension_numbers<[1], [0], [0], [1], [0, 0, 1, 1], [], []>} : vector<8x8xbf16>, vector<8x32xbf16>, vector<8x32xf32> -> vector<8x32xf32>
    %80 = arith.addf %56, %79 : vector<8x32xf32>
    %81 = vector.extract_strided_slice %29 {offsets = [0, 16], sizes = [8, 8], strides = [1, 1]} : vector<8x32xf32> to vector<8x8xf32>
    %82 = arith.truncf %81 : vector<8x8xf32> to vector<8x8xbf16>
    %83 = vector.extract_strided_slice %30 {offsets = [0, 16], sizes = [8, 8], strides = [1, 1]} : vector<8x32xf32> to vector<8x8xf32>
    %84 = arith.truncf %83 : vector<8x8xf32> to vector<8x8xbf16>
    %85 = vector.extract_strided_slice %31 {offsets = [0, 16], sizes = [8, 8], strides = [1, 1]} : vector<8x32xf32> to vector<8x8xf32>
    %86 = arith.truncf %85 : vector<8x8xf32> to vector<8x8xbf16>
    %cst_30 = arith.constant dense<0.000000e+00> : vector<8x8xf32>
    %87 = tpu.matmul %82, %84, %cst_30 {dimension_numbers = #tpu.dot_dimension_numbers<[1], [1], [0], [0], [0, 0, 1, 0], [], []>} : vector<8x8xbf16>, vector<8x8xbf16>, vector<8x8xf32> -> vector<8x8xf32>
    %cst_31 = arith.constant dense<0xFF800000> : vector<8xf32>
    %88 = vector.multi_reduction <maximumf>, %87, %cst_31 [1] : vector<8x8xf32> to vector<8xf32>
    %89 = vector.shape_cast %88 : vector<8xf32> to vector<8x1xf32>
    %90 = vector.broadcast %89 : vector<8x1xf32> to vector<8x8xf32>
    %91 = arith.subf %87, %90 : vector<8x8xf32>
    %92 = math.exp %91 : vector<8x8xf32>
    %cst_32 = arith.constant dense<0.000000e+00> : vector<8xf32>
    %93 = vector.multi_reduction <add>, %92, %cst_32 [1] : vector<8x8xf32> to vector<8xf32>
    %94 = vector.shape_cast %93 : vector<8xf32> to vector<8x1xf32>
    %95 = tpu.reciprocal %94 {approx = true} : vector<8x1xf32> -> vector<8x1xf32>
    %96 = vector.broadcast %95 : vector<8x1xf32> to vector<8x8xf32>
    %97 = arith.mulf %92, %96 : vector<8x8xf32>
    %98 = arith.truncf %97 : vector<8x8xf32> to vector<8x8xbf16>
    %cst_33 = arith.constant dense<0.000000e+00> : vector<8x8xf32>
    %99 = tpu.matmul %98, %86, %cst_33 {dimension_numbers = #tpu.dot_dimension_numbers<[1], [0], [0], [1], [0, 0, 1, 1], [], []>} : vector<8x8xbf16>, vector<8x8xbf16>, vector<8x8xf32> -> vector<8x8xf32>
    %100 = arith.truncf %99 : vector<8x8xf32> to vector<8x8xbf16>
    %c2 = arith.constant 2 : index
    %c0_34 = arith.constant 0 : index
    %c0_35 = arith.constant 0 : index
    %101 = vector.load %arg5[%c2, %c0_34, %c0_35] : memref<4x8x32xbf16, #tpu.memory_space<vmem>>, vector<1x8x32xbf16>
    %102 = vector.shape_cast %101 : vector<1x8x32xbf16> to vector<8x32xbf16>
    %cst_36 = arith.constant dense<0.000000e+00> : vector<8x32xf32>
    %103 = tpu.matmul %100, %102, %cst_36 {dimension_numbers = #tpu.dot_dimension_numbers<[1], [0], [0], [1], [0, 0, 1, 1], [], []>} : vector<8x8xbf16>, vector<8x32xbf16>, vector<8x32xf32> -> vector<8x32xf32>
    %104 = arith.addf %80, %103 : vector<8x32xf32>
    %105 = vector.extract_strided_slice %29 {offsets = [0, 24], sizes = [8, 8], strides = [1, 1]} : vector<8x32xf32> to vector<8x8xf32>
    %106 = arith.truncf %105 : vector<8x8xf32> to vector<8x8xbf16>
    %107 = vector.extract_strided_slice %30 {offsets = [0, 24], sizes = [8, 8], strides = [1, 1]} : vector<8x32xf32> to vector<8x8xf32>
    %108 = arith.truncf %107 : vector<8x8xf32> to vector<8x8xbf16>
    %109 = vector.extract_strided_slice %31 {offsets = [0, 24], sizes = [8, 8], strides = [1, 1]} : vector<8x32xf32> to vector<8x8xf32>
    %110 = arith.truncf %109 : vector<8x8xf32> to vector<8x8xbf16>
    %cst_37 = arith.constant dense<0.000000e+00> : vector<8x8xf32>
    %111 = tpu.matmul %106, %108, %cst_37 {dimension_numbers = #tpu.dot_dimension_numbers<[1], [1], [0], [0], [0, 0, 1, 0], [], []>} : vector<8x8xbf16>, vector<8x8xbf16>, vector<8x8xf32> -> vector<8x8xf32>
    %cst_38 = arith.constant dense<0xFF800000> : vector<8xf32>
    %112 = vector.multi_reduction <maximumf>, %111, %cst_38 [1] : vector<8x8xf32> to vector<8xf32>
    %113 = vector.shape_cast %112 : vector<8xf32> to vector<8x1xf32>
    %114 = vector.broadcast %113 : vector<8x1xf32> to vector<8x8xf32>
    %115 = arith.subf %111, %114 : vector<8x8xf32>
    %116 = math.exp %115 : vector<8x8xf32>
    %cst_39 = arith.constant dense<0.000000e+00> : vector<8xf32>
    %117 = vector.multi_reduction <add>, %116, %cst_39 [1] : vector<8x8xf32> to vector<8xf32>
    %118 = vector.shape_cast %117 : vector<8xf32> to vector<8x1xf32>
    %119 = tpu.reciprocal %118 {approx = true} : vector<8x1xf32> -> vector<8x1xf32>
    %120 = vector.broadcast %119 : vector<8x1xf32> to vector<8x8xf32>
    %121 = arith.mulf %116, %120 : vector<8x8xf32>
    %122 = arith.truncf %121 : vector<8x8xf32> to vector<8x8xbf16>
    %cst_40 = arith.constant dense<0.000000e+00> : vector<8x8xf32>
    %123 = tpu.matmul %122, %110, %cst_40 {dimension_numbers = #tpu.dot_dimension_numbers<[1], [0], [0], [1], [0, 0, 1, 1], [], []>} : vector<8x8xbf16>, vector<8x8xbf16>, vector<8x8xf32> -> vector<8x8xf32>
    %124 = arith.truncf %123 : vector<8x8xf32> to vector<8x8xbf16>
    %c3 = arith.constant 3 : index
    %c0_41 = arith.constant 0 : index
    %c0_42 = arith.constant 0 : index
    %125 = vector.load %arg5[%c3, %c0_41, %c0_42] : memref<4x8x32xbf16, #tpu.memory_space<vmem>>, vector<1x8x32xbf16>
    %126 = vector.shape_cast %125 : vector<1x8x32xbf16> to vector<8x32xbf16>
    %cst_43 = arith.constant dense<0.000000e+00> : vector<8x32xf32>
    %127 = tpu.matmul %124, %126, %cst_43 {dimension_numbers = #tpu.dot_dimension_numbers<[1], [0], [0], [1], [0, 0, 1, 1], [], []>} : vector<8x8xbf16>, vector<8x32xbf16>, vector<8x32xf32> -> vector<8x32xf32>
    %128 = arith.addf %104, %127 : vector<8x32xf32>
    %129 = arith.addf %1, %128 : vector<8x32xf32>
    %c0_44 = arith.constant 0 : index
    %c0_45 = arith.constant 0 : index
    %130 = vector.load %arg6[%c0_44, %c0_45] : memref<1x32xf32, #tpu.memory_space<vmem>>, vector<1x32xf32>
    %131 = vector.broadcast %130 : vector<1x32xf32> to vector<8x32xf32>
    %132 = arith.addf %129, %131 : vector<8x32xf32>
    %c0_46 = arith.constant 0 : index
    %c0_47 = arith.constant 0 : index
    %133 = vector.load %arg7[%c0_46, %c0_47] : memref<1x32xf32, #tpu.memory_space<vmem>>, vector<1x32xf32>
    %c0_48 = arith.constant 0 : index
    %c0_49 = arith.constant 0 : index
    %134 = vector.load %arg8[%c0_48, %c0_49] : memref<1x32xf32, #tpu.memory_space<vmem>>, vector<1x32xf32>
    %cst_50 = arith.constant dense<0.000000e+00> : vector<8xf32>
    %135 = vector.multi_reduction <add>, %132, %cst_50 [1] : vector<8x32xf32> to vector<8xf32>
    %136 = vector.shape_cast %135 : vector<8xf32> to vector<8x1xf32>
    %cst_51 = arith.constant 3.200000e+01 : f32
    %137 = vector.broadcast %cst_51 : f32 to vector<8x1xf32>
    %138 = arith.divf %136, %137 : vector<8x1xf32>
    %139 = vector.broadcast %138 : vector<8x1xf32> to vector<8x32xf32>
    %140 = arith.subf %132, %139 : vector<8x32xf32>
    %141 = arith.mulf %140, %140 : vector<8x32xf32>
    %cst_52 = arith.constant dense<0.000000e+00> : vector<8xf32>
    %142 = vector.multi_reduction <add>, %141, %cst_52 [1] : vector<8x32xf32> to vector<8xf32>
    %143 = vector.shape_cast %142 : vector<8xf32> to vector<8x1xf32>
    %cst_53 = arith.constant 3.200000e+01 : f32
    %144 = vector.broadcast %cst_53 : f32 to vector<8x1xf32>
    %145 = arith.divf %143, %144 : vector<8x1xf32>
    %cst_54 = arith.constant 9.99999974E-6 : f32
    %146 = vector.broadcast %cst_54 : f32 to vector<8x1xf32>
    %147 = arith.addf %145, %146 : vector<8x1xf32>
    %148 = math.rsqrt %147 : vector<8x1xf32>
    %149 = vector.broadcast %148 : vector<8x1xf32> to vector<8x32xf32>
    %150 = arith.mulf %140, %149 : vector<8x32xf32>
    %151 = vector.broadcast %133 : vector<1x32xf32> to vector<8x32xf32>
    %152 = arith.mulf %150, %151 : vector<8x32xf32>
    %153 = vector.broadcast %134 : vector<1x32xf32> to vector<8x32xf32>
    %154 = arith.addf %152, %153 : vector<8x32xf32>
    %155 = arith.truncf %154 : vector<8x32xf32> to vector<8x32xbf16>
    %c0_55 = arith.constant 0 : index
    %c0_56 = arith.constant 0 : index
    %156 = vector.load %arg9[%c0_55, %c0_56] : memref<32x128xbf16, #tpu.memory_space<vmem>>, vector<32x128xbf16>
    %cst_57 = arith.constant dense<0.000000e+00> : vector<8x128xf32>
    %157 = tpu.matmul %155, %156, %cst_57 {dimension_numbers = #tpu.dot_dimension_numbers<[1], [0], [0], [1], [0, 0, 1, 1], [], []>} : vector<8x32xbf16>, vector<32x128xbf16>, vector<8x128xf32> -> vector<8x128xf32>
    %c0_58 = arith.constant 0 : index
    %c0_59 = arith.constant 0 : index
    %158 = vector.load %arg10[%c0_58, %c0_59] : memref<1x128xf32, #tpu.memory_space<vmem>>, vector<1x128xf32>
    %159 = vector.broadcast %158 : vector<1x128xf32> to vector<8x128xf32>
    %160 = arith.addf %157, %159 : vector<8x128xf32>
    %cst_60 = arith.constant 5.000000e-01 : f32
    %161 = vector.broadcast %cst_60 : f32 to vector<8x128xf32>
    %162 = arith.mulf %161, %160 : vector<8x128xf32>
    %cst_61 = arith.constant 0.707106769 : f32
    %163 = vector.broadcast %cst_61 : f32 to vector<8x128xf32>
    %164 = arith.mulf %160, %163 : vector<8x128xf32>
    %165 = math.erf %164 : vector<8x128xf32>
    %cst_62 = arith.constant 1.000000e+00 : f32
    %166 = vector.broadcast %cst_62 : f32 to vector<8x128xf32>
    %167 = arith.addf %166, %165 : vector<8x128xf32>
    %168 = arith.mulf %162, %167 : vector<8x128xf32>
    %169 = arith.truncf %168 : vector<8x128xf32> to vector<8x128xbf16>
    %c0_63 = arith.constant 0 : index
    %c0_64 = arith.constant 0 : index
    %170 = vector.load %arg11[%c0_63, %c0_64] : memref<128x32xbf16, #tpu.memory_space<vmem>>, vector<128x32xbf16>
    %cst_65 = arith.constant dense<0.000000e+00> : vector<8x32xf32>
    %171 = tpu.matmul %169, %170, %cst_65 {dimension_numbers = #tpu.dot_dimension_numbers<[1], [0], [0], [1], [0, 0, 1, 1], [], []>} : vector<8x128xbf16>, vector<128x32xbf16>, vector<8x32xf32> -> vector<8x32xf32>
    %c0_66 = arith.constant 0 : index
    %c0_67 = arith.constant 0 : index
    %172 = vector.load %arg12[%c0_66, %c0_67] : memref<1x32xf32, #tpu.memory_space<vmem>>, vector<1x32xf32>
    %173 = vector.broadcast %172 : vector<1x32xf32> to vector<8x32xf32>
    %174 = arith.addf %171, %173 : vector<8x32xf32>
    %175 = arith.addf %132, %174 : vector<8x32xf32>
    %c0_68 = arith.constant 0 : index
    %c0_69 = arith.constant 0 : index
    %c0_70 = arith.constant 0 : index
    %176 = vector.load %arg13[%c0_68, %c0_69, %c0_70] : memref<1x8x32xf32, #tpu.memory_space<vmem>>, vector<1x8x32xf32>
    %177 = vector.shape_cast %176 : vector<1x8x32xf32> to vector<8x32xf32>
    %178 = vector.shape_cast %175 : vector<8x32xf32> to vector<1x8x32xf32>
    tpu.vector_store %arg13[%c0_68, %c0_69, %c0_70], %178 {strides = array<i32>} : memref<1x8x32xf32, #tpu.memory_space<vmem>>, vector<1x8x32xf32>,
    return
  }
  func.func @transform_0(%arg0: i32) -> (i32, i32, i32) {
    %c0_i32 = arith.constant 0 : i32
    %c0_i32_0 = arith.constant 0 : i32
    %c0_i32_1 = arith.constant 0 : i32
    return %arg0, %c0_i32, %c0_i32_0 : i32, i32, i32
  }
  func.func @transform_1(%arg0: i32) -> (i32, i32) {
    %c0_i32 = arith.constant 0 : i32
    %c0_i32_0 = arith.constant 0 : i32
    %c0_i32_1 = arith.constant 0 : i32
    return %c0_i32, %c0_i32_0 : i32, i32
  }
  func.func @transform_2(%arg0: i32) -> (i32, i32) {
    %c0_i32 = arith.constant 0 : i32
    %c0_i32_0 = arith.constant 0 : i32
    %c0_i32_1 = arith.constant 0 : i32
    return %c0_i32, %c0_i32_0 : i32, i32
  }
  func.func @transform_3(%arg0: i32) -> (i32, i32) {
    %c0_i32 = arith.constant 0 : i32
    %c0_i32_0 = arith.constant 0 : i32
    %c0_i32_1 = arith.constant 0 : i32
    return %c0_i32, %c0_i32_0 : i32, i32
  }
  func.func @transform_4(%arg0: i32) -> (i32, i32, i32) {
    %c0_i32 = arith.constant 0 : i32
    %c0_i32_0 = arith.constant 0 : i32
    %c0_i32_1 = arith.constant 0 : i32
    %c0_i32_2 = arith.constant 0 : i32
    return %c0_i32, %c0_i32_0, %c0_i32_1 : i32, i32, i32
  }
  func.func @transform_5(%arg0: i32) -> (i32, i32) {
    %c0_i32 = arith.constant 0 : i32
    %c0_i32_0 = arith.constant 0 : i32
    %c0_i32_1 = arith.constant 0 : i32
    return %c0_i32, %c0_i32_0 : i32, i32
  }
  func.func @transform_6(%arg0: i32) -> (i32, i32) {
    %c0_i32 = arith.constant 0 : i32
    %c0_i32_0 = arith.constant 0 : i32
    %c0_i32_1 = arith.constant 0 : i32
    return %c0_i32, %c0_i32_0 : i32, i32
  }
  func.func @transform_7(%arg0: i32) -> (i32, i32) {
    %c0_i32 = arith.constant 0 : i32
    %c0_i32_0 = arith.constant 0 : i32
    %c0_i32_1 = arith.constant 0 : i32
    return %c0_i32, %c0_i32_0 : i32, i32
  }
  func.func @transform_8(%arg0: i32) -> (i32, i32) {
    %c0_i32 = arith.constant 0 : i32
    %c0_i32_0 = arith.constant 0 : i32
    %c0_i32_1 = arith.constant 0 : i32
    return %c0_i32, %c0_i32_0 : i32, i32
  }
  func.func @transform_9(%arg0: i32) -> (i32, i32) {
    %c0_i32 = arith.constant 0 : i32
    %c0_i32_0 = arith.constant 0 : i32
    %c0_i32_1 = arith.constant 0 : i32
    return %c0_i32, %c0_i32_0 : i32, i32
  }
  func.func @transform_10(%arg0: i32) -> (i32, i32) {
    %c0_i32 = arith.constant 0 : i32
    %c0_i32_0 = arith.constant 0 : i32
    %c0_i32_1 = arith.constant 0 : i32
    return %c0_i32, %c0_i32_0 : i32, i32
  }
  func.func @transform_11(%arg0: i32) -> (i32, i32) {
    %c0_i32 = arith.constant 0 : i32
    %c0_i32_0 = arith.constant 0 : i32
    %c0_i32_1 = arith.constant 0 : i32
    return %c0_i32, %c0_i32_0 : i32, i32
  }
  func.func @transform_12(%arg0: i32) -> (i32, i32, i32) {
    %c0_i32 = arith.constant 0 : i32
    %c0_i32_0 = arith.constant 0 : i32
    %c0_i32_1 = arith.constant 0 : i32
    return %arg0, %c0_i32, %c0_i32_0 : i32, i32, i32
  }
}

module attributes {stable_mosaic.version = 11 : i64} {
  func.func @block_kernel(%arg0: i32, %arg1: memref<1x8x32xf32, #tpu.memory_space<vmem>>, %arg2: memref<1x32xf32, #tpu.memory_space<vmem>>, %arg3: memref<1x32xf32, #tpu.memory_space<vmem>>, %arg4: memref<32x96xbf16, #tpu.memory_space<vmem>>, %arg5: memref<4x8x32xbf16, #tpu.memory_space<vmem>>, %arg6: memref<1x32xf32, #tpu.memory_space<vmem>>, %arg7: memref<1x32xf32, #tpu.memory_space<vmem>>, %arg8: memref<1x32xf32, #tpu.memory_space<vmem>>, %arg9: memref<32x128xbf16, #tpu.memory_space<vmem>>, %arg10: memref<1x128xf32, #tpu.memory_space<vmem>>, %arg11: memref<128x32xbf16, #tpu.memory_space<vmem>>, %arg12: memref<1x32xf32, #tpu.memory_space<vmem>>, %arg13: memref<1x8x32xf32, #tpu.memory_space<vmem>>) attributes {dimension_semantics = [#tpu.dimension_semantics<parallel>], iteration_bounds = array<i64: 2>, scalar_prefetch = 0 : i64, scratch_operands = 0 : i64, tpu.core_type = #tpu.core_type<tc>, window_params = [{transform_indices = @transform_0, window_bounds = array<i64: 1, 8, 32>}, {pipeline_mode = #tpu.pipeline_mode<synchronous>, transform_indices = @transform_1, window_bounds = array<i64: 1, 32>}, {pipeline_mode = #tpu.pipeline_mode<synchronous>, transform_indices = @transform_2, window_bounds = array<i64: 1, 32>}, {pipeline_mode = #tpu.pipeline_mode<synchronous>, transform_indices = @transform_3, window_bounds = array<i64: 32, 96>}, {pipeline_mode = #tpu.pipeline_mode<synchronous>, transform_indices = @transform_4, window_bounds = array<i64: 4, 8, 32>}, {pipeline_mode = #tpu.pipeline_mode<synchronous>, transform_indices = @transform_5, window_bounds = array<i64: 1, 32>}, {pipeline_mode = #tpu.pipeline_mode<synchronous>, transform_indices = @transform_6, window_bounds = array<i64: 1, 32>}, {pipeline_mode = #tpu.pipeline_mode<synchronous>, transform_indices = @transform_7, window_bounds = array<i64: 1, 32>}, {pipeline_mode = #tpu.pipeline_mode<synchronous>, transform_indices = @transform_8, window_bounds = array<i64: 32, 128>}, {pipeline_mode = #tpu.pipeline_mode<synchronous>, transform_indices = @transform_9, window_bounds = array<i64: 1, 128>}, {pipeline_mode = #tpu.pipeline_mode<synchronous>, transform_indices = @transform_10, window_bounds = array<i64: 128, 32>}, {pipeline_mode = #tpu.pipeline_mode<synchronous>, transform_indices = @transform_11, window_bounds = array<i64: 1, 32>}, {transform_indices = @transform_12, window_bounds = array<i64: 1, 8, 32>}]} {
    %c0 = arith.constant 0 : index
    %c0_0 = arith.constant 0 : index
    %c0_1 = arith.constant 0 : index
    %0 = vector.load %arg1[%c0, %c0_0, %c0_1] : memref<1x8x32xf32, #tpu.memory_space<vmem>>, vector<1x8x32xf32>
    %1 = vector.shape_cast %0 : vector<1x8x32xf32> to vector<8x32xf32>
    %c0_2 = arith.constant 0 : index
    %c0_3 = arith.constant 0 : index
    %2 = vector.load %arg2[%c0_2, %c0_3] : memref<1x32xf32, #tpu.memory_space<vmem>>, vector<1x32xf32>
    %c0_4 = arith.constant 0 : index
    %c0_5 = arith.constant 0 : index
    %3 = vector.load %arg3[%c0_4, %c0_5] : memref<1x32xf32, #tpu.memory_space<vmem>>, vector<1x32xf32>
    %cst = arith.constant dense<0.000000e+00> : vector<8xf32>
    %4 = vector.multi_reduction <add>, %1, %cst [1] : vector<8x32xf32> to vector<8xf32>
    %5 = vector.shape_cast %4 : vector<8xf32> to vector<8x1xf32>
    %cst_6 = arith.constant 3.200000e+01 : f32
    %6 = vector.broadcast %cst_6 : f32 to vector<8x1xf32>
    %7 = arith.divf %5, %6 : vector<8x1xf32>
    %8 = vector.broadcast %7 : vector<8x1xf32> to vector<8x32xf32>
    %9 = arith.subf %1, %8 : vector<8x32xf32>
    %10 = arith.mulf %9, %9 : vector<8x32xf32>
    %cst_7 = arith.constant dense<0.000000e+00> : vector<8xf32>
    %11 = vector.multi_reduction <add>, %10, %cst_7 [1] : vector<8x32xf32> to vector<8xf32>
    %12 = vector.shape_cast %11 : vector<8xf32> to vector<8x1xf32>
    %cst_8 = arith.constant 3.200000e+01 : f32
    %13 = vector.broadcast %cst_8 : f32 to vector<8x1xf32>
    %14 = arith.divf %12, %13 : vector<8x1xf32>
    %cst_9 = arith.constant 9.99999974E-6 : f32
    %15 = vector.broadcast %cst_9 : f32 to vector<8x1xf32>
    %16 = arith.addf %14, %15 : vector<8x1xf32>
    %17 = math.rsqrt %16 : vector<8x1xf32>
    %18 = vector.broadcast %17 : vector<8x1xf32> to vector<8x32xf32>
    %19 = arith.mulf %9, %18 : vector<8x32xf32>
    %20 = vector.broadcast %2 : vector<1x32xf32> to vector<8x32xf32>
    %21 = arith.mulf %19, %20 : vector<8x32xf32>
    %22 = vector.broadcast %3 : vector<1x32xf32> to vector<8x32xf32>
    %23 = arith.addf %21, %22 : vector<8x32xf32>
    %24 = arith.truncf %23 : vector<8x32xf32> to vector<8x32xbf16>
    %c0_10 = arith.constant 0 : index
    %c0_11 = arith.constant 0 : index
    %25 = vector.load %arg4[%c0_10, %c0_11] : memref<32x96xbf16, #tpu.memory_space<vmem>>, vector<32x96xbf16>
    %cst_12 = arith.constant dense<0.000000e+00> : vector<8x96xf32>
    %26 = tpu.matmul %24, %25, %cst_12 {dimension_numbers = #tpu.dot_dimension_numbers<[1], [0], [0], [1], [0, 0, 1, 1], [], []>} : vector<8x32xbf16>, vector<32x96xbf16>, vector<8x96xf32> -> vector<8x96xf32>
    %27 = vector.extract_strided_slice %26 {offsets = [0, 0], sizes = [8, 32], strides = [1, 1]} : vector<8x96xf32> to vector<8x32xf32>
    %cst_13 = arith.constant 0.353553385 : f32
    %28 = vector.broadcast %cst_13 : f32 to vector<8x32xf32>
    %29 = arith.mulf %27, %28 : vector<8x32xf32>
    %30 = vector.extract_strided_slice %26 {offsets = [0, 32], sizes = [8, 32], strides = [1, 1]} : vector<8x96xf32> to vector<8x32xf32>
    %31 = vector.extract_strided_slice %26 {offsets = [0, 64], sizes = [8, 32], strides = [1, 1]} : vector<8x96xf32> to vector<8x32xf32>
    %cst_14 = arith.constant 0.000000e+00 : f32
    %32 = vector.broadcast %cst_14 : f32 to vector<8x32xf32>
    %33 = vector.extract_strided_slice %29 {offsets = [0, 0], sizes = [8, 8], strides = [1, 1]} : vector<8x32xf32> to vector<8x8xf32>
    %34 = arith.truncf %33 : vector<8x8xf32> to vector<8x8xbf16>
    %35 = vector.extract_strided_slice %30 {offsets = [0, 0], sizes = [8, 8], strides = [1, 1]} : vector<8x32xf32> to vector<8x8xf32>
    %36 = arith.truncf %35 : vector<8x8xf32> to vector<8x8xbf16>
    %37 = vector.extract_strided_slice %31 {offsets = [0, 0], sizes = [8, 8], strides = [1, 1]} : vector<8x32xf32> to vector<8x8xf32>
    %38 = arith.truncf %37 : vector<8x8xf32> to vector<8x8xbf16>
    %cst_15 = arith.constant dense<0.000000e+00> : vector<8x8xf32>
    %39 = tpu.matmul %34, %36, %cst_15 {dimension_numbers = #tpu.dot_dimension_numbers<[1], [1], [0], [0], [0, 0, 1, 0], [], []>} : vector<8x8xbf16>, vector<8x8xbf16>, vector<8x8xf32> -> vector<8x8xf32>
    %cst_16 = arith.constant dense<0xFF800000> : vector<8xf32>
    %40 = vector.multi_reduction <maximumf>, %39, %cst_16 [1] : vector<8x8xf32> to vector<8xf32>
    %41 = vector.shape_cast %40 : vector<8xf32> to vector<8x1xf32>
    %42 = vector.broadcast %41 : vector<8x1xf32> to vector<8x8xf32>
    %43 = arith.subf %39, %42 : vector<8x8xf32>
    %44 = math.exp %43 : vector<8x8xf32>
    %cst_17 = arith.constant dense<0.000000e+00> : vector<8xf32>
    %45 = vector.multi_reduction <add>, %44, %cst_17 [1] : vector<8x8xf32> to vector<8xf32>
    %46 = vector.shape_cast %45 : vector<8xf32> to vector<8x1xf32>
    %47 = tpu.reciprocal %46 {approx = true} : vector<8x1xf32> -> vector<8x1xf32>
    %48 = vector.broadcast %47 : vector<8x1xf32> to vector<8x8xf32>
    %49 = arith.mulf %44, %48 : vector<8x8xf32>
    %50 = arith.truncf %49 : vector<8x8xf32> to vector<8x8xbf16>
    %cst_18 = arith.constant dense<0.000000e+00> : vector<8x8xf32>
    %51 = tpu.matmul %50, %38, %cst_18 {dimension_numbers = #tpu.dot_dimension_numbers<[1], [0], [0], [1], [0, 0, 1, 1], [], []>} : vector<8x8xbf16>, vector<8x8xbf16>, vector<8x8xf32> -> vector<8x8xf32>
    %52 = arith.truncf %51 : vector<8x8xf32> to vector<8x8xbf16>
    %c0_19 = arith.constant 0 : index
    %c0_20 = arith.constant 0 : index
    %c0_21 = arith.constant 0 : index
    %53 = vector.load %arg5[%c0_19, %c0_20, %c0_21] : memref<4x8x32xbf16, #tpu.memory_space<vmem>>, vector<1x8x32xbf16>
    %54 = vector.shape_cast %53 : vector<1x8x32xbf16> to vector<8x32xbf16>
    %cst_22 = arith.constant dense<0.000000e+00> : vector<8x32xf32>
    %55 = tpu.matmul %52, %54, %cst_22 {dimension_numbers = #tpu.dot_dimension_numbers<[1], [0], [0], [1], [0, 0, 1, 1], [], []>} : vector<8x8xbf16>, vector<8x32xbf16>, vector<8x32xf32> -> vector<8x32xf32>
    %56 = arith.addf %32, %55 : vector<8x32xf32>
    %57 = vector.extract_strided_slice %29 {offsets = [0, 8], sizes = [8, 8], strides = [1, 1]} : vector<8x32xf32> to vector<8x8xf32>
    %58 = arith.truncf %57 : vector<8x8xf32> to vector<8x8xbf16>
    %59 = vector.extract_strided_slice %30 {offsets = [0, 8], sizes = [8, 8], strides = [1, 1]} : vector<8x32xf32> to vector<8x8xf32>
    %60 = arith.truncf %59 : vector<8x8xf32> to vector<8x8xbf16>
    %61 = vector.extract_strided_slice %31 {offsets = [0, 8], sizes = [8, 8], strides = [1, 1]} : vector<8x32xf32> to vector<8x8xf32>
    %62 = arith.truncf %61 : vector<8x8xf32> to vector<8x8xbf16>
    %cst_23 = arith.constant dense<0.000000e+00> : vector<8x8xf32>
    %63 = tpu.matmul %58, %60, %cst_23 {dimension_numbers = #tpu.dot_dimension_numbers<[1], [1], [0], [0], [0, 0, 1, 0], [], []>} : vector<8x8xbf16>, vector<8x8xbf16>, vector<8x8xf32> -> vector<8x8xf32>
    %cst_24 = arith.constant dense<0xFF800000> : vector<8xf32>
    %64 = vector.multi_reduction <maximumf>, %63, %cst_24 [1] : vector<8x8xf32> to vector<8xf32>
    %65 = vector.shape_cast %64 : vector<8xf32> to vector<8x1xf32>
    %66 = vector.broadcast %65 : vector<8x1xf32> to vector<8x8xf32>
    %67 = arith.subf %63, %66 : vector<8x8xf32>
    %68 = math.exp %67 : vector<8x8xf32>
    %cst_25 = arith.constant dense<0.000000e+00> : vector<8xf32>
    %69 = vector.multi_reduction <add>, %68, %cst_25 [1] : vector<8x8xf32> to vector<8xf32>
    %70 = vector.shape_cast %69 : vector<8xf32> to vector<8x1xf32>
    %71 = tpu.reciprocal %70 {approx = true} : vector<8x1xf32> -> vector<8x1xf32>
    %72 = vector.broadcast %71 : vector<8x1xf32> to vector<8x8xf32>
    %73 = arith.mulf %68, %72 : vector<8x8xf32>
    %74 = arith.truncf %73 : vector<8x8xf32> to vector<8x8xbf16>
    %cst_26 = arith.constant dense<0.000000e+00> : vector<8x8xf32>
    %75 = tpu.matmul %74, %62, %cst_26 {dimension_numbers = #tpu.dot_dimension_numbers<[1], [0], [0], [1], [0, 0, 1, 1], [], []>} : vector<8x8xbf16>, vector<8x8xbf16>, vector<8x8xf32> -> vector<8x8xf32>
    %76 = arith.truncf %75 : vector<8x8xf32> to vector<8x8xbf16>
    %c1 = arith.constant 1 : index
    %c0_27 = arith.constant 0 : index
    %c0_28 = arith.constant 0 : index
    %77 = vector.load %arg5[%c1, %c0_27, %c0_28] : memref<4x8x32xbf16, #tpu.memory_space<vmem>>, vector<1x8x32xbf16>
    %78 = vector.shape_cast %77 : vector<1x8x32xbf16> to vector<8x32xbf16>
    %cst_29 = arith.constant dense<0.000000e+00> : vector<8x32xf32>
    %79 = tpu.matmul %76, %78, %cst_29 {dimension_numbers = #tpu.dot_dimension_numbers<[1], [0], [0], [1], [0, 0, 1, 1], [], []>} : vector<8x8xbf16>, vector<8x32xbf16>, vector<8x32xf32> -> vector<8x32xf32>
    %80 = arith.addf %56, %79 : vector<8x32xf32>
    %81 = vector.extract_strided_slice %29 {offsets = [0, 16], sizes = [8, 8], strides = [1, 1]} : vector<8x32xf32> to vector<8x8xf32>
    %82 = arith.truncf %81 : vector<8x8xf32> to vector<8x8xbf16>
    %83 = vector.extract_strided_slice %30 {offsets = [0, 16], sizes = [8, 8], strides = [1, 1]} : vector<8x32xf32> to vector<8x8xf32>
    %84 = arith.truncf %83 : vector<8x8xf32> to vector<8x8xbf16>
    %85 = vector.extract_strided_slice %31 {offsets = [0, 16], sizes = [8, 8], strides = [1, 1]} : vector<8x32xf32> to vector<8x8xf32>
    %86 = arith.truncf %85 : vector<8x8xf32> to vector<8x8xbf16>
    %cst_30 = arith.constant dense<0.000000e+00> : vector<8x8xf32>
    %87 = tpu.matmul %82, %84, %cst_30 {dimension_numbers = #tpu.dot_dimension_numbers<[1], [1], [0], [0], [0, 0, 1, 0], [], []>} : vector<8x8xbf16>, vector<8x8xbf16>, vector<8x8xf32> -> vector<8x8xf32>
    %cst_31 = arith.constant dense<0xFF800000> : vector<8xf32>
    %88 = vector.multi_reduction <maximumf>, %87, %cst_31 [1] : vector<8x8xf32> to vector<8xf32>
    %89 = vector.shape_cast %88 : vector<8xf32> to vector<8x1xf32>
    %90 = vector.broadcast %89 : vector<8x1xf32> to vector<8x8xf32>
    %91 = arith.subf %87, %90 : vector<8x8xf32>
    %92 = math.exp %91 : vector<8x8xf32>
    %cst_32 = arith.constant dense<0.000000e+00> : vector<8xf32>
    %93 = vector.multi_reduction <add>, %92, %cst_32 [1] : vector<8x8xf32> to vector<8xf32>
    %94 = vector.shape_cast %93 : vector<8xf32> to vector<8x1xf32>
    %95 = tpu.reciprocal %94 {approx = true} : vector<8x1xf32> -> vector<8x1xf32>
    %96 = vector.broadcast %95 : vector<8x1xf32> to vector<8x8xf32>
    %97 = arith.mulf %92, %96 : vector<8x8xf32>
    %98 = arith.truncf %97 : vector<8x8xf32> to vector<8x8xbf16>
    %cst_33 = arith.constant dense<0.000000e+00> : vector<8x8xf32>
    %99 = tpu.matmul %98, %86, %cst_33 {dimension_numbers = #tpu.dot_dimension_numbers<[1], [0], [0], [1], [0, 0, 1, 1], [], []>} : vector<8x8xbf16>, vector<8x8xbf16>, vector<8x8xf32> -> vector<8x8xf32>
    %100 = arith.truncf %99 : vector<8x8xf32> to vector<8x8xbf16>
    %c2 = arith.constant 2 : index
    %c0_34 = arith.constant 0 : index
    %c0_35 = arith.constant 0 : index
    %101 = vector.load %arg5[%c2, %c0_34, %c0_35] : memref<4x8x32xbf16, #tpu.memory_space<vmem>>, vector<1x8x32xbf16>
    %102 = vector.shape_cast %101 : vector<1x8x32xbf16> to vector<8x32xbf16>
    %cst_36 = arith.constant dense<0.000000e+00> : vector<8x32xf32>
    %103 = tpu.matmul %100, %102, %cst_36 {dimension_numbers = #tpu.dot_dimension_numbers<[1], [0], [0], [1], [0, 0, 1, 1], [], []>} : vector<8x8xbf16>, vector<8x32xbf16>, vector<8x32xf32> -> vector<8x32xf32>
    %104 = arith.addf %80, %103 : vector<8x32xf32>
    %105 = vector.extract_strided_slice %29 {offsets = [0, 24], sizes = [8, 8], strides = [1, 1]} : vector<8x32xf32> to vector<8x8xf32>
    %106 = arith.truncf %105 : vector<8x8xf32> to vector<8x8xbf16>
    %107 = vector.extract_strided_slice %30 {offsets = [0, 24], sizes = [8, 8], strides = [1, 1]} : vector<8x32xf32> to vector<8x8xf32>
    %108 = arith.truncf %107 : vector<8x8xf32> to vector<8x8xbf16>
    %109 = vector.extract_strided_slice %31 {offsets = [0, 24], sizes = [8, 8], strides = [1, 1]} : vector<8x32xf32> to vector<8x8xf32>
    %110 = arith.truncf %109 : vector<8x8xf32> to vector<8x8xbf16>
    %cst_37 = arith.constant dense<0.000000e+00> : vector<8x8xf32>
    %111 = tpu.matmul %106, %108, %cst_37 {dimension_numbers = #tpu.dot_dimension_numbers<[1], [1], [0], [0], [0, 0, 1, 0], [], []>} : vector<8x8xbf16>, vector<8x8xbf16>, vector<8x8xf32> -> vector<8x8xf32>
    %cst_38 = arith.constant dense<0xFF800000> : vector<8xf32>
    %112 = vector.multi_reduction <maximumf>, %111, %cst_38 [1] : vector<8x8xf32> to vector<8xf32>
    %113 = vector.shape_cast %112 : vector<8xf32> to vector<8x1xf32>
    %114 = vector.broadcast %113 : vector<8x1xf32> to vector<8x8xf32>
    %115 = arith.subf %111, %114 : vector<8x8xf32>
    %116 = math.exp %115 : vector<8x8xf32>
    %cst_39 = arith.constant dense<0.000000e+00> : vector<8xf32>
    %117 = vector.multi_reduction <add>, %116, %cst_39 [1] : vector<8x8xf32> to vector<8xf32>
    %118 = vector.shape_cast %117 : vector<8xf32> to vector<8x1xf32>
    %119 = tpu.reciprocal %118 {approx = true} : vector<8x1xf32> -> vector<8x1xf32>
    %120 = vector.broadcast %119 : vector<8x1xf32> to vector<8x8xf32>
    %121 = arith.mulf %116, %120 : vector<8x8xf32>
    %122 = arith.truncf %121 : vector<8x8xf32> to vector<8x8xbf16>
    %cst_40 = arith.constant dense<0.000000e+00> : vector<8x8xf32>
    %123 = tpu.matmul %122, %110, %cst_40 {dimension_numbers = #tpu.dot_dimension_numbers<[1], [0], [0], [1], [0, 0, 1, 1], [], []>} : vector<8x8xbf16>, vector<8x8xbf16>, vector<8x8xf32> -> vector<8x8xf32>
    %124 = arith.truncf %123 : vector<8x8xf32> to vector<8x8xbf16>
    %c3 = arith.constant 3 : index
    %c0_41 = arith.constant 0 : index
    %c0_42 = arith.constant 0 : index
    %125 = vector.load %arg5[%c3, %c0_41, %c0_42] : memref<4x8x32xbf16, #tpu.memory_space<vmem>>, vector<1x8x32xbf16>
    %126 = vector.shape_cast %125 : vector<1x8x32xbf16> to vector<8x32xbf16>
    %cst_43 = arith.constant dense<0.000000e+00> : vector<8x32xf32>
    %127 = tpu.matmul %124, %126, %cst_43 {dimension_numbers = #tpu.dot_dimension_numbers<[1], [0], [0], [1], [0, 0, 1, 1], [], []>} : vector<8x8xbf16>, vector<8x32xbf16>, vector<8x32xf32> -> vector<8x32xf32>
    %128 = arith.addf %104, %127 : vector<8x32xf32>
    %129 = arith.addf %1, %128 : vector<8x32xf32>
    %c0_44 = arith.constant 0 : index
    %c0_45 = arith.constant 0 : index
    %130 = vector.load %arg6[%c0_44, %c0_45] : memref<1x32xf32, #tpu.memory_space<vmem>>, vector<1x32xf32>
    %131 = vector.broadcast %130 : vector<1x32xf32> to vector<8x32xf32>
    %132 = arith.addf %129, %131 : vector<8x32xf32>
    %c0_46 = arith.constant 0 : index
    %c0_47 = arith.constant 0 : index
    %133 = vector.load %arg7[%c0_46, %c0_47] : memref<1x32xf32, #tpu.memory_space<vmem>>, vector<1x32xf32>
    %c0_48 = arith.constant 0 : index
    %c0_49 = arith.constant 0 : index
    %134 = vector.load %arg8[%c0_48, %c0_49] : memref<1x32xf32, #tpu.memory_space<vmem>>, vector<1x32xf32>
    %cst_50 = arith.constant dense<0.000000e+00> : vector<8xf32>
    %135 = vector.multi_reduction <add>, %132, %cst_50 [1] : vector<8x32xf32> to vector<8xf32>
    %136 = vector.shape_cast %135 : vector<8xf32> to vector<8x1xf32>
    %cst_51 = arith.constant 3.200000e+01 : f32
    %137 = vector.broadcast %cst_51 : f32 to vector<8x1xf32>
    %138 = arith.divf %136, %137 : vector<8x1xf32>
    %139 = vector.broadcast %138 : vector<8x1xf32> to vector<8x32xf32>
    %140 = arith.subf %132, %139 : vector<8x32xf32>
    %141 = arith.mulf %140, %140 : vector<8x32xf32>
    %cst_52 = arith.constant dense<0.000000e+00> : vector<8xf32>
    %142 = vector.multi_reduction <add>, %141, %cst_52 [1] : vector<8x32xf32> to vector<8xf32>
    %143 = vector.shape_cast %142 : vector<8xf32> to vector<8x1xf32>
    %cst_53 = arith.constant 3.200000e+01 : f32
    %144 = vector.broadcast %cst_53 : f32 to vector<8x1xf32>
    %145 = arith.divf %143, %144 : vector<8x1xf32>
    %cst_54 = arith.constant 9.99999974E-6 : f32
    %146 = vector.broadcast %cst_54 : f32 to vector<8x1xf32>
    %147 = arith.addf %145, %146 : vector<8x1xf32>
    %148 = math.rsqrt %147 : vector<8x1xf32>
    %149 = vector.broadcast %148 : vector<8x1xf32> to vector<8x32xf32>
    %150 = arith.mulf %140, %149 : vector<8x32xf32>
    %151 = vector.broadcast %133 : vector<1x32xf32> to vector<8x32xf32>
    %152 = arith.mulf %150, %151 : vector<8x32xf32>
    %153 = vector.broadcast %134 : vector<1x32xf32> to vector<8x32xf32>
    %154 = arith.addf %152, %153 : vector<8x32xf32>
    %155 = arith.truncf %154 : vector<8x32xf32> to vector<8x32xbf16>
    %c0_55 = arith.constant 0 : index
    %c0_56 = arith.constant 0 : index
    %156 = vector.load %arg9[%c0_55, %c0_56] : memref<32x128xbf16, #tpu.memory_space<vmem>>, vector<32x128xbf16>
    %cst_57 = arith.constant dense<0.000000e+00> : vector<8x128xf32>
    %157 = tpu.matmul %155, %156, %cst_57 {dimension_numbers = #tpu.dot_dimension_numbers<[1], [0], [0], [1], [0, 0, 1, 1], [], []>} : vector<8x32xbf16>, vector<32x128xbf16>, vector<8x128xf32> -> vector<8x128xf32>
    %c0_58 = arith.constant 0 : index
    %c0_59 = arith.constant 0 : index
    %158 = vector.load %arg10[%c0_58, %c0_59] : memref<1x128xf32, #tpu.memory_space<vmem>>, vector<1x128xf32>
    %159 = vector.broadcast %158 : vector<1x128xf32> to vector<8x128xf32>
    %160 = arith.addf %157, %159 : vector<8x128xf32>
    %cst_60 = arith.constant 5.000000e-01 : f32
    %161 = vector.broadcast %cst_60 : f32 to vector<8x128xf32>
    %162 = arith.mulf %161, %160 : vector<8x128xf32>
    %cst_61 = arith.constant 0.707106769 : f32
    %163 = vector.broadcast %cst_61 : f32 to vector<8x128xf32>
    %164 = arith.mulf %160, %163 : vector<8x128xf32>
    %165 = math.erf %164 : vector<8x128xf32>
    %cst_62 = arith.constant 1.000000e+00 : f32
    %166 = vector.broadcast %cst_62 : f32 to vector<8x128xf32>
    %167 = arith.addf %166, %165 : vector<8x128xf32>
    %168 = arith.mulf %162, %167 : vector<8x128xf32>
    %169 = arith.truncf %168 : vector<8x128xf32> to vector<8x128xbf16>
    %c0_63 = arith.constant 0 : index
    %c0_64 = arith.constant 0 : index
    %170 = vector.load %arg11[%c0_63, %c0_64] : memref<128x32xbf16, #tpu.memory_space<vmem>>, vector<128x32xbf16>
    %cst_65 = arith.constant dense<0.000000e+00> : vector<8x32xf32>
    %171 = tpu.matmul %169, %170, %cst_65 {dimension_numbers = #tpu.dot_dimension_numbers<[1], [0], [0], [1], [0, 0, 1, 1], [], []>} : vector<8x128xbf16>, vector<128x32xbf16>, vector<8x32xf32> -> vector<8x32xf32>
    %c0_66 = arith.constant 0 : index
    %c0_67 = arith.constant 0 : index
    %172 = vector.load %arg12[%c0_66, %c0_67] : memref<1x32xf32, #tpu.memory_space<vmem>>, vector<1x32xf32>
    %173 = vector.broadcast %172 : vector<1x32xf32> to vector<8x32xf32>
    %174 = arith.addf %171, %173 : vector<8x32xf32>
    %175 = arith.addf %132, %174 : vector<8x32xf32>
    %c0_68 = arith.constant 0 : index
    %c0_69 = arith.constant 0 : index
    %c0_70 = arith.constant 0 : index
    %176 = vector.load %arg13[%c0_68, %c0_69, %c0_70] : memref<1x8x32xf32, #tpu.memory_space<vmem>>, vector<1x8x32xf32>
    %177 = vector.shape_cast %176 : vector<1x8x32xf32> to vector<8x32xf32>
    %178 = vector.shape_cast %175 : vector<8x32xf32> to vector<1x8x32xf32>
    tpu.vector_store %arg13[%c0_68, %c0_69, %c0_70], %178 {strides = array<i32>} : memref<1x8x32xf32, #tpu.memory_space<vmem>>, vector<1x8x32xf32>,
    return
  }
  func.func @transform_0(%arg0: i32) -> (i32, i32, i32) {
    %c0_i32 = arith.constant 0 : i32
    %c0_i32_0 = arith.constant 0 : i32
    %c0_i32_1 = arith.constant 0 : i32
    return %arg0, %c0_i32, %c0_i32_0 : i32, i32, i32
  }
  func.func @transform_1(%arg0: i32) -> (i32, i32) {
    %c0_i32 = arith.constant 0 : i32
    %c0_i32_0 = arith.constant 0 : i32
    %c0_i32_1 = arith.constant 0 : i32
    return %c0_i32, %c0_i32_0 : i32, i32
  }
  func.func @transform_2(%arg0: i32) -> (i32, i32) {
    %c0_i32 = arith.constant 0 : i32
    %c0_i32_0 = arith.constant 0 : i32
    %c0_i32_1 = arith.constant 0 : i32
    return %c0_i32, %c0_i32_0 : i32, i32
  }
  func.func @transform_3(%arg0: i32) -> (i32, i32) {
    %c0_i32 = arith.constant 0 : i32
    %c0_i32_0 = arith.constant 0 : i32
    %c0_i32_1 = arith.constant 0 : i32
    return %c0_i32, %c0_i32_0 : i32, i32
  }
  func.func @transform_4(%arg0: i32) -> (i32, i32, i32) {
    %c0_i32 = arith.constant 0 : i32
    %c0_i32_0 = arith.constant 0 : i32
    %c0_i32_1 = arith.constant 0 : i32
    %c0_i32_2 = arith.constant 0 : i32
    return %c0_i32, %c0_i32_0, %c0_i32_1 : i32, i32, i32
  }
  func.func @transform_5(%arg0: i32) -> (i32, i32) {
    %c0_i32 = arith.constant 0 : i32
    %c0_i32_0 = arith.constant 0 : i32
    %c0_i32_1 = arith.constant 0 : i32
    return %c0_i32, %c0_i32_0 : i32, i32
  }
  func.func @transform_6(%arg0: i32) -> (i32, i32) {
    %c0_i32 = arith.constant 0 : i32
    %c0_i32_0 = arith.constant 0 : i32
    %c0_i32_1 = arith.constant 0 : i32
    return %c0_i32, %c0_i32_0 : i32, i32
  }
  func.func @transform_7(%arg0: i32) -> (i32, i32) {
    %c0_i32 = arith.constant 0 : i32
    %c0_i32_0 = arith.constant 0 : i32
    %c0_i32_1 = arith.constant 0 : i32
    return %c0_i32, %c0_i32_0 : i32, i32
  }
  func.func @transform_8(%arg0: i32) -> (i32, i32) {
    %c0_i32 = arith.constant 0 : i32
    %c0_i32_0 = arith.constant 0 : i32
    %c0_i32_1 = arith.constant 0 : i32
    return %c0_i32, %c0_i32_0 : i32, i32
  }
  func.func @transform_9(%arg0: i32) -> (i32, i32) {
    %c0_i32 = arith.constant 0 : i32
    %c0_i32_0 = arith.constant 0 : i32
    %c0_i32_1 = arith.constant 0 : i32
    return %c0_i32, %c0_i32_0 : i32, i32
  }
  func.func @transform_10(%arg0: i32) -> (i32, i32) {
    %c0_i32 = arith.constant 0 : i32
    %c0_i32_0 = arith.constant 0 : i32
    %c0_i32_1 = arith.constant 0 : i32
    return %c0_i32, %c0_i32_0 : i32, i32
  }
  func.func @transform_11(%arg0: i32) -> (i32, i32) {
    %c0_i32 = arith.constant 0 : i32
    %c0_i32_0 = arith.constant 0 : i32
    %c0_i32_1 = arith.constant 0 : i32
    return %c0_i32, %c0_i32_0 : i32, i32
  }
  func.func @transform_12(%arg0: i32) -> (i32, i32, i32) {
    %c0_i32 = arith.constant 0 : i32
    %c0_i32_0 = arith.constant 0 : i32
    %c0_i32_1 = arith.constant 0 : i32
    return %arg0, %c0_i32, %c0_i32_0 : i32, i32, i32
  }
}

</mosaic_0001>

<bundles_post_ra>
// kernel: tpu_custom_call.1
= control target key start
LH: loop header
LB: loop body
LE: loop exit
PB: predicated region body
PF: predicated region fallthrough
CT: control target
= control target key end

     0   :  { %s1613_s0 = inlined_call_operand.vmem [shape: f32[2,8,32], index: 0, kind: input, shape index: {}]   ;;  %s1614_s1 = inlined_call_operand.vmem [shape: f32[1,32], index: 1, kind: input, shape index: {}]   ;;  %s1615_s2 = inlined_call_operand.vmem [shape: f32[1,32], index: 2, kind: input, shape index: {}]   ;;  %s1616_s3 = inlined_call_operand.vmem [shape: bf16[32,96], index: 3, kind: input, shape index: {}]   ;;  %s1617_s4 = inlined_call_operand.vmem [shape: bf16[4,8,32], index: 4, kind: input, shape index: {}]   ;;  %s1618_s5 = inlined_call_operand.vmem [shape: f32[1,32], index: 5, kind: input, shape index: {}]   ;;  %s1619_s6 = inlined_call_operand.vmem [shape: f32[1,32], index: 6, kind: input, shape index: {}]   ;;  %s1620_s7 = inlined_call_operand.vmem [shape: f32[1,32], index: 7, kind: input, shape index: {}]   ;;  %s1621_s8 = inlined_call_operand.vmem [shape: bf16[32,128], index: 8, kind: input, shape index: {}]   ;;  %s1622_s9 = inlined_call_operand.vmem [shape: f32[1,128], index: 9, kind: input, shape index: {}]   ;;  %s1623_s10 = inlined_call_operand.vmem [shape: bf16[128,32], index: 10, kind: input, shape index: {}]   ;;  %s1624_s11 = inlined_call_operand.vmem [shape: f32[1,32], index: 11, kind: input, shape index: {}]   ;;  %s1625_s12 = inlined_call_operand.hbm [shape: f32[2,8,32], index: 12, kind: output, shape index: {}]  }
   0x1   :  { %1626 = sst [smem:[#allocation5_spill]] %s1613_s0 }
   0x2   :  { %1627 = sst [smem:[#allocation6_spill]] %s1614_s1 }
   0x3   :  { %1628 = sst [smem:[#allocation7_spill]] %s1615_s2 }
   0x4   :  { %17 = vsyncpa [#allocation3], 0 }
   0x5   :  { %19 = vsyncpa [#allocation3 + $0x1], 0  ;;  %s1391_s21 = smov 0   ;;  %s1393_s22 = smov 0  }
   0x6   :  { %s1395_s23 = smov 0   ;;  %s1397_s24 = smov 0  }
   0x7 LB: > { %s1412_s25 = sadd.s32 4294967295, %s1312_s24   ;;  %s1080_s26 = sadd.s32 4294967294, %s1312_s24   ;;  %s1312_s24 = sphi %s1397_s24, %s1637_s24   ;;  %s1308_s23 = sphi %s1395_s23, %s1636_s23   ;;  %s1304_s22 = sphi %s1393_s22, %s1635_s22   ;;  %s1300_s21 = sphi %s1391_s21, %s1634_s21  }
   0x8   : > { %s1416_s27 = sadd.s32 1, %s1312_s24   ;;  %s289_s28 = sadd.s32 1, %s1308_s23 }
   0x9   : > { %s286_s29 = ssub.s32 %s1312_s24, %s1416_s27  ;;  %p299_p0 = scmp.ne.s32.totalorder %s1308_s23, %s1304_s22 }
   0xa   : > { %p287_p1 = scmp.eq.s32.totalorder %s286_s29, 0  ;;  %p300_p2 = scmp.eq.s32.totalorder %s1412_s25, 1 }
   0xb   : > { %p305_p3 = scmp.ne.s32.totalorder %s1304_s22, %s1300_s21  ;;  %p306_p4 = scmp.eq.s32.totalorder %s1080_s26, 1 }
   0xc   : > { %s1427_s30 = scalar_select %p287_p1, %s1308_s23, %s289_s28  }
   0xd   : > { %p1429_p5 = por %p300_p2, %p299_p0  ;;  %p1433_p6 = por %p306_p4, %p305_p3 }
   0xe   : > { %p1083_p7 = scmp.ge.s32.totalorder %s1312_s24, 1  ;;  %p364_p8 = scmp.lt.s32.totalorder %s1312_s24, 3 }
  0x10   : > { %p365_p9 = pnand %p1083_p7, %p364_p8 }
  0x11   : > { %p405_p10 = scmp.lt.s32.totalorder (!%p365_p9), %s1412_s25, 1  ;;  %s1631_s0 = sld [smem:[#allocation5_spill]] (!%p365_p9) }
  0x12   : > { %368 = sbr.rel (%p365_p9) target bundleno = 2327 (0x917), region = 68  ;;  %s1632_s1 = sld [smem:[#allocation6_spill]] (!%p365_p9) }
  0x13   : > { %s1633_s2 = sld [smem:[#allocation7_spill]] (!%p365_p9)  ;;  %s1316_s20 = smov (!%p365_p9), 96  }
  0x14   : > { %s1317_s26 = smov (!%p365_p9), 80   ;;  %s1318_s28 = smov (!%p365_p9), 112  }
  0x15   : > { %s1319_s29 = smov (!%p365_p9), 64   ;;  %s1322_s17 = smov (!%p365_p9), 104  }
  0x17   : > { %s406_s15 = scalar_select %p405_p10, %s1412_s25, 1  ;;  %vm413_vm0 = vcmask 261120   ;;  %v1314_v2 = vmov 32.0   ;;  %v1157_v14 = vld [vmem:[%s1616_s3 + $0x8] sm:$0xff]  ;;  %v1156_v15 = vld [vmem:[%s1616_s3] sm:$0xff]  ;;  %vm490_vm5 = vcmask 64512  }
  0x18   : > { %1226 = vrcp.f32 %v1314_v2  ;;  %477 = vmatpush.bf16.msra.mxu0 %v1157_v14  ;;  %v1219_v25 = vld [vmem:[%s1632_s1] ss:$0 sm:$0xff]  ;;  %vm527_vm6 = vcmask 1043456  }
  0x19   : > { %s1085_s16 = sshll.u32 %s406_s15, 3  ;;  %v1220_v28 = vld [vmem:[%s1633_s2] ss:$0 sm:$0xff]  ;;  %s1320_s15 = smov 120  }
  0x1a   : > { %s408_s19 = scalar_lea.vmem %s1631_s0, %s1085_s16  ;;  %s1321_s16 = smov 72   ;;  %v545_v51 = vld [vmem:[%s1617_s4] sm:$0xf] }
  0x1b   : > { %v1444_v0 = vld [vmem:[%s408_s19] sm:$0xff]  ;;  %s1315_s19 = smov 88   ;;  %v629_v52 = vsel %vm527_vm6, %v545_v51, 0 }
  0x1c   : > { %v414_v1 = vsel %vm413_vm0, %v1444_v0, 0.0  ;;  %478 = vmatpush.bf16.msra.mxu0 %v1156_v15  ;;  %638 = vmatpush.bf16.msra.mxu1 %v629_v52 }
  0x1d   : > { %415 = vadd.xlane.f32.xlu0 %v414_v1 }
  0x1e   : > { %v1227_v3 = vpop.eup %1226 }
  0x1f   : > { %v418_v4 = vmul.f32 32.0, %v1227_v3  ;;  %vm422_vm1 = vweird.f32 %v1227_v3 }
  0x21   : > { %v419_v5 = vsub.f32 1.0, %v418_v4 }
  0x23   : > { %v420_v6 = vmul.f32 %v1227_v3, %v419_v5 }
  0x25   : > { %v421_v7 = vadd.f32 %v1227_v3, %v420_v6 }
  0x27   : > { %v1448_v8 = vsel %vm422_vm1, %v1227_v3, %v421_v7 }
  0x90   : > { %v416_v9 = vpop.xlane.xlu0 %415 }
  0x91   : > { %v424_v10 = vmul.f32 %v1448_v8, %v416_v9 }
  0x93   : > { %v425_v11 = vsub.f32 %v1444_v0, %v424_v10 }
  0x95   : > { %v426_v12 = vmul.f32 %v425_v11, %v425_v11 }
  0x97   : > { %v427_v13 = vsel %vm413_vm0, %v426_v12, 0.0 }
  0x98   : > { %428 = vadd.xlane.f32.xlu0 %v427_v13 }
 0x10b   : > { %v429_v16 = vpop.xlane.xlu0 %428 }
 0x10c   : > { %v430_v17 = vmul.f32 %v429_v16, %v1448_v8 }
 0x10e   : > { %v431_v18 = vadd.f32 1e-05, %v430_v17 }
 0x110   : > { %1228 = vrsqrt.f32 %v431_v18  ;;  %vm438_vm3 = vweird.f32 %v431_v18 }
 0x116   : > { %v1229_v19 = vpop.eup %1228 }
 0x117   : > { %v433_v20 = vmul.f32 %v1229_v19, %v431_v18  ;;  %vm439_vm2 = vweird.f32 %v1229_v19 }
 0x118   : > { %vm440_vm4 = vmor %vm438_vm3, %vm439_vm2 }
 0x119   : > { %v434_v21 = vmul.f32 %v1229_v19, %v433_v20 }
 0x11b   : > { %v435_v22 = vmul.f32 0.5, %v434_v21 }
 0x11d   : > { %v436_v23 = vsub.f32 1.5, %v435_v22 }
 0x11f   : > { %v437_v24 = vmul.f32 %v1229_v19, %v436_v23 }
 0x121   : > { %v441_v26 = vsel %vm440_vm4, %v1229_v19, %v437_v24 }
 0x122   : > { %v442_v27 = vmul.f32 %v441_v26, %v425_v11 }
 0x124   : > { %v446_v29 = vmul.f32 %v1219_v25, %v442_v27 }
 0x126   : > { %v450_v30 = vadd.f32 %v1220_v28, %v446_v29 }
 0x128   : > { %v451_v31 = vpack.c.bf16 %v450_v30, %v450_v30 }
 0x12a   : > { %1094 = vmatmul.msk.bf16.vlgmr.msra.gmra.mxu0 %vm413_vm0, %v451_v31 }
 0x1a7   : > { %v480_v32 = vpop.f32.mrf.mxu0 }
 0x1a8   : > { %v1467_v33 = vpack.c.bf16 %v480_v32, %v480_v32  ;;  %v484_v35 = vmul.f32 0.35355338, %v480_v32 }
 0x1aa   : > { %549 = vrot.lane.b32.xlu0 %v1467_v33, %s1315_s19  ;;  %488 = vrot.lane.b32.xlu1 %v1467_v33, %s1316_s20  ;;  %v485_v36 = vpack.c.bf16 %v484_v35, %v484_v35  ;;  %s1323_s20 = smov 40  }
 0x1af   : > { %v482_v34 = vpop.f32.mrf.mxu0 }
 0x1b2   : > { %646 = vrot.lane.b32.xlu0 %v1467_v33, %s1317_s26  ;;  %s1324_s26 = smov 56  }
 0x1ba   : > { %644 = vrot.lane.b32.xlu0 %v485_v36, %s1318_s28  ;;  %s1325_s28 = smov 48  }
 0x21c   : > { %v550_v37 = vpop.permute.xlu0 %549  ;;  %v489_v38 = vpop.permute.xlu1 %488 }
 0x21d   : > { %v495_v39 = vsel %vm490_vm5, %v489_v38, 0  ;;  %v555_v40 = vsel %vm490_vm5, %v550_v37, 0 }
 0x21e   : > { %504 = vmatpush.bf16.xpose.msra.mxu3 %v495_v39 }
 0x224   : > { %v647_v41 = vpop.permute.xlu0 %646 }
 0x225   : > { %v652_v42 = vsel %vm490_vm5, %v647_v41, 0  ;;  %1095 = vmatmul.msk.bf16.vlgmr.msra.gmra.mxu3 %vm490_vm5, %v485_v36 }
 0x226   : > { %564 = vmatpush.bf16.xpose.msrb.mxu3 %v555_v40 }
 0x22c   : > { %v645_v62 = vpop.permute.xlu0 %644 }
 0x22e   : > { %661 = vmatpush.bf16.xpose.msra.mxu3 %v652_v42 }
 0x2a8   : > { %v506_v43 = vpop.f32.mrf.mxu3 }
 0x2a9   : > { %v510_v44 = vsel %vm490_vm5, %v506_v43, -inf }
 0x2aa   : > { %511 = vmax.xlane.f32.xlu1 %v510_v44 }
 0x2b0   : > { %v508_v45 = vpop.f32.mrf.mxu3 }
 0x2b1   : > { %v1099_v45 = vld [vmem:[%s1617_s4 + $0x4] sm:$0xf] }
 0x31d   : > { %v512_v46 = vpop.xlane.xlu1 %511 }
 0x31e   : > { %v513_v47 = vsub.f32 %v506_v43, %v512_v46  ;;  %v610_v46 = vsel %vm527_vm6, %v1099_v45, 0 }
 0x31f   : > { %619 = vmatpush.bf16.msrb.mxu0 %v610_v46 }
 0x320   : > { %v514_v48 = vmul.f32 1.442695, %v513_v47 }
 0x322   : > { %1230 = vpow2.f32 %v514_v48  ;;  %v1104_v48 = vld [vmem:[%s1617_s4 + $0x8] sm:$0xf] }
 0x328   : > { %v1231_v49 = vpop.eup %1230 }
 0x329   : > { %v516_v50 = vsel %vm490_vm5, %v1231_v49, 0.0 }
 0x32a   : > { %517 = vadd.xlane.f32.xlu2 %v516_v50 }
 0x342   : > { %522 = vrot.lane.b32.xlu2 %v1467_v33, %s1319_s29  ;;  %s1153_s29 = sshll.u32 %s1412_s25, 3 }
 0x343   : > { %s1016_s19 = scalar_lea.hbm %s1625_s12, %s1153_s29 }
 0x344   : > { %s1020_s1 = sshll.u32 %s1016_s19, 4  ;;  %s1021_s1 = int_to_ptr.hbm [resolvable:$true] %s1020_s1 }
 0x345   : > { %s1264_s2 = sshra.s32 %s1021_s1, 4  ;;  %s1265_s2 = int_to_ptr.hbm [resolvable:$true] %s1264_s2 }
 0x346   : > { %p1271_p0 = scmp.lt.s32.totalorder %s1265_s2, %s1625_s12 }
 0x34a   : > { %547 = vrot.lane.b32.xlu2 %v485_v36, %s1320_s15  ;;  %s1266_s15 = scalar_lea.hbm %s1265_s2, 8 }
 0x34b   : > { %p1267_p11 = scmp.ne.s32.totalorder %s1265_s2, %s1266_s15 }
 0x34d   : > { %p1268_p12 = pnand %p1267_p11, %p1429_p5 }
 0x34f   : > { %p1269_p13 = pneg %p1268_p12 }
 0x352   : > { %725 = vrot.lane.b32.xlu2 %v1467_v33, %s1321_s16 }
 0x35a   : > { %723 = vrot.lane.b32.xlu2 %v485_v36, %s1322_s17 }
 0x39d   : > { %v518_v53 = vpop.xlane.xlu2 %517 }
 0x39e   : > { %1232 = vrcp.f32 %v518_v53  ;;  %v1108_v53 = vld [vmem:[%s1617_s4 + $0xc] sm:$0xf] }
 0x3a4   : > { %v1233_v54 = vpop.eup %1232 }
 0x3a5   : > { %v523_v55 = vpop.permute.xlu2 %522  ;;  %v520_v56 = vmul.f32 %v1233_v54, %v1231_v49  ;;  %v707_v49 = vsel %vm527_vm6, %v1104_v48, 0  ;;  %v786_v54 = vsel %vm527_vm6, %v1108_v53, 0 }
 0x3a6   : > { %v529_v57 = vsel %vm527_vm6, %v523_v55, 0  ;;  %716 = vmatpush.bf16.msra.mxu0 %v707_v49 }
 0x3a7   : > { %538 = vmatpush.bf16.msra.mxu2 %v529_v57  ;;  %v521_v58 = vpack.c.bf16 %v520_v56, %v520_v56 }
 0x3aa   : > { %1096 = vmatmul.msk.bf16.vlgmr.msra.gmra.mxu2 %vm490_vm5, %v521_v58 }
 0x3ad   : > { %v548_v59 = vpop.permute.xlu2 %547 }
 0x3ae   : > { %1097 = vmatmul.msk.bf16.vlgmr.msrb.gmra.mxu3 %vm490_vm5, %v548_v59 }
 0x3b5   : > { %v726_v60 = vpop.permute.xlu2 %725 }
 0x3b6   : > { %v731_v61 = vsel %vm490_vm5, %v726_v60, 0 }
 0x3b7   : > { %740 = vmatpush.bf16.xpose.msrb.mxu1 %v731_v61 }
 0x3bd   : > { %v724_v6 = vpop.permute.xlu2 %723 }
 0x3be   : > { %1102 = vmatmul.msk.bf16.vlgmr.msra.gmra.mxu3 %vm490_vm5, %v645_v62 }
 0x42d   : > { %v540_v63 = vpop.f32.mrf.mxu2 }
 0x42e   : > { %v544_v1 = vpack.c.bf16 %v540_v63, %v540_v63 }
 0x430   : > { %1101 = vmatmul.msk.bf16.vlgmr.msra.gmra.mxu1 %vm490_vm5, %v544_v1 }
 0x431   : > { %v566_v2 = vpop.f32.mrf.mxu3 }
 0x432   : > { %v570_v3 = vsel %vm490_vm5, %v566_v2, -inf }
 0x433   : > { %571 = vmax.xlane.f32.xlu1 %v570_v3 }
 0x435   : > { %v542_v4 = vpop.f32.mrf.mxu2 }
 0x439   : > { %v568_v5 = vpop.f32.mrf.mxu3 }
 0x440   : > { %1106 = vmatmul.msk.bf16.vlgmr.msrb.gmra.mxu1 %vm490_vm5, %v724_v6 }
 0x441   : > { %v663_v7 = vpop.f32.mrf.mxu3 }
 0x442   : > { %v667_v9 = vsel %vm490_vm5, %v663_v7, -inf }
 0x443   : > { %668 = vmax.xlane.f32.xlu2 %v667_v9 }
 0x449   : > { %v665_v10 = vpop.f32.mrf.mxu3 }
 0x44a   : > { %v1221_v10 = vld [vmem:[%s1618_s5] ss:$0 sm:$0xff] }
 0x45b   : > { %758 = vrot.lane.b32.xlu2 %v1467_v33, %s1323_s20 }
 0x4a6   : > { %v572_v11 = vpop.xlane.xlu1 %571 }
 0x4a7   : > { %v573_v12 = vsub.f32 %v566_v2, %v572_v11 }
 0x4a9   : > { %v574_v13 = vmul.f32 1.442695, %v573_v12 }
 0x4ab   : > { %1234 = vpow2.f32 %v574_v13 }
 0x4ad   : > { %v1494_v14 = vpop.f32.mrf.mxu1 }
 0x4b1   : > { %v1235_v15 = vpop.eup %1234 }
 0x4b2   : > { %v576_v16 = vsel %vm490_vm5, %v1235_v15, 0.0 }
 0x4b3   : > { %577 = vadd.xlane.f32.xlu1 %v576_v16 }
 0x4b5   : > { %v642_v17 = vpop.f32.mrf.mxu1 }
 0x4b6   : > { %v669_v18 = vpop.xlane.xlu2 %668 }
 0x4b7   : > { %v670_v19 = vsub.f32 %v663_v7, %v669_v18 }
 0x4b9   : > { %v671_v20 = vmul.f32 1.442695, %v670_v19 }
 0x4bb   : > { %1236 = vpow2.f32 %v671_v20  ;;  %v1158_v20 = vld [vmem:[%s1621_s8] sm:$0xff] }
 0x4bd   : > { %v742_v21 = vpop.f32.mrf.mxu1 }
 0x4be   : > { %v759_v22 = vpop.permute.xlu2 %758  ;;  %v746_v23 = vsel %vm490_vm5, %v742_v21, -inf }
 0x4bf   : > { %v764_v24 = vsel %vm527_vm6, %v759_v22, 0  ;;  %747 = vmax.xlane.f32.xlu0 %v746_v23 }
 0x4c0   : > { %773 = vmatpush.bf16.msrb.mxu3 %v764_v24 }
 0x4c1   : > { %v1237_v25 = vpop.eup %1236 }
 0x4c2   : > { %v673_v27 = vsel %vm490_vm5, %v1237_v25, 0.0 }
 0x4c5   : > { %v744_v26 = vpop.f32.mrf.mxu1 }
 0x4c7   : > { %674 = vadd.xlane.f32.xlu0 %v673_v27 }
 0x4cc   : > { %582 = vrot.lane.b32.xlu1 %v1467_v33, %s1324_s26  ;;  %s402_s26 = sand.u32 1, %s1304_s22  }
 0x4cd   : > { %s1006_s25 = scalar_lea.sflag [#allocation3], %s402_s26 }
 0x4db   : > { %679 = vrot.lane.b32.xlu0 %v1467_v33, %s1325_s28  ;;  %s1084_s28 = sshll.u32 %s402_s26, 3 }
 0x4dc   : > { %s404_s20 = scalar_lea.vmem [#allocation2], %s1084_s28  ;;  %s1270_s28 = scalar_lea.hbm %s1625_s12, 16 }
 0x4dd   : > { %s1018_s0 = sshll.u32 %s404_s20, 4  ;;  %p1272_p1 = scmp.lt.s32.totalorder %s1270_s28, %s1266_s15  ;;  %s1019_s0 = int_to_ptr.vmem [resolvable:$true] %s1018_s0 }
 0x4df   : > { %p1273_p2 = por %p1272_p1, %p1271_p0 }
 0x4e1   : > { %p1274_p3 = pnand %p1273_p2, %p1269_p13 }
 0x526   : > { %v578_v28 = vpop.xlane.xlu1 %577 }
 0x527   : > { %1238 = vrcp.f32 %v578_v28 }
 0x52d   : > { %v1239_v32 = vpop.eup %1238 }
 0x52e   : > { %v580_v35 = vmul.f32 %v1239_v32, %v1235_v15 }
 0x530   : > { %v581_v40 = vpack.c.bf16 %v580_v35, %v580_v35 }
 0x532   : > { %v748_v29 = vpop.xlane.xlu0 %747 }
 0x533   : > { %v749_v30 = vsub.f32 %v742_v21, %v748_v29 }
 0x535   : > { %v750_v31 = vmul.f32 1.442695, %v749_v30  ;;  %v1222_v30 = vld [vmem:[%s1619_s6] ss:$0 sm:$0xff] }
 0x537   : > { %1240 = vpow2.f32 %v750_v31 }
 0x53a   : > { %v675_v39 = vpop.xlane.xlu0 %674 }
 0x53b   : > { %1242 = vrcp.f32 %v675_v39  ;;  %v1224_v39 = vld [vmem:[%s1622_s9] ss:$0 sm:$0xff] }
 0x53d   : > { %v1241_v34 = vpop.eup %1240 }
 0x53e   : > { %v583_v36 = vpop.permute.xlu1 %582  ;;  %v752_v37 = vsel %vm490_vm5, %v1241_v34, 0.0 }
 0x53f   : > { %753 = vadd.xlane.f32.xlu1 %v752_v37  ;;  %v588_v38 = vsel %vm527_vm6, %v583_v36, 0  ;;  %v1167_v37 = vld [vmem:[%s1623_s10 + $0x38] sm:$0xff] }
 0x540   : > { %597 = vmatpush.bf16.msrb.mxu2 %v588_v38  ;;  %990 = vmatpush.bf16.msra.mxu1 %v1167_v37  ;;  %v1166_v38 = vld [vmem:[%s1623_s10 + $0x30] sm:$0xff] }
 0x541   : > { %v1243_v33 = vpop.eup %1242 }
 0x542   : > { %v677_v41 = vmul.f32 %v1243_v33, %v1237_v25  ;;  %v1165_v33 = vld [vmem:[%s1623_s10 + $0x28] sm:$0xff] }
 0x543   : > { %1098 = vmatmul.msk.bf16.vlgmr.msrb.gmra.mxu2 %vm490_vm5, %v581_v40 }
 0x544   : > { %v678_v44 = vpack.c.bf16 %v677_v41, %v677_v41  ;;  %991 = vmatpush.bf16.msra.mxu1 %v1166_v38 }
 0x548   : > { %992 = vmatpush.bf16.msra.mxu1 %v1165_v33 }
 0x54d   : > { %v680_v42 = vpop.permute.xlu0 %679 }
 0x54e   : > { %v685_v43 = vsel %vm527_vm6, %v680_v42, 0 }
 0x54f   : > { %694 = vmatpush.bf16.msra.mxu2 %v685_v43  ;;  %v1164_v43 = vld [vmem:[%s1623_s10 + $0x20] sm:$0xff] }
 0x550   : > { %993 = vmatpush.bf16.msra.mxu1 %v1164_v43 }
 0x553   : > { %1103 = vmatmul.msk.bf16.vlgmr.msra.gmra.mxu2 %vm490_vm5, %v678_v44 }
 0x554   : > { %795 = vmatpush.bf16.msrb.mxu2 %v786_v54 }
 0x5b2   : > { %v754_v47 = vpop.xlane.xlu1 %753 }
 0x5b3   : > { %1244 = vrcp.f32 %v754_v47  ;;  %v1163_v47 = vld [vmem:[%s1623_s10 + $0x18] sm:$0xff] }
 0x5b4   : > { %994 = vmatpush.bf16.msra.mxu1 %v1163_v47 }
 0x5b9   : > { %v1245_v50 = vpop.eup %1244 }
 0x5ba   : > { %v756_v51 = vmul.f32 %v1245_v50, %v1241_v34 }
 0x5bc   : > { %v757_v52 = vpack.c.bf16 %v756_v51, %v756_v51 }
 0x5be   : > { %1107 = vmatmul.msk.bf16.vlgmr.msrb.gmra.mxu3 %vm490_vm5, %v757_v52  ;;  %v1162_v52 = vld [vmem:[%s1623_s10 + $0x10] sm:$0xff] }
 0x5bf   : > { %995 = vmatpush.bf16.msra.mxu1 %v1162_v52 }
 0x5c6   : > { %v599_v55 = vpop.f32.mrf.mxu2 }
 0x5c7   : > { %v603_v56 = vpack.c.bf16 %v599_v55, %v599_v55 }
 0x5c9   : > { %1100 = vmatmul.msk.bf16.vlgmr.msrb.gmra.mxu0 %vm490_vm5, %v603_v56 }
 0x5ce   : > { %v601_v57 = vpop.f32.mrf.mxu2 }
 0x5cf   : > { %v1161_v57 = vld [vmem:[%s1623_s10 + $0x8] sm:$0xff] }
 0x5d0   : > { %996 = vmatpush.bf16.msra.mxu1 %v1161_v57 }
 0x5d6   : > { %v696_v58 = vpop.f32.mrf.mxu2 }
 0x5d7   : > { %v700_v59 = vpack.c.bf16 %v696_v58, %v696_v58 }
 0x5d9   : > { %1105 = vmatmul.msk.bf16.vlgmr.msra.gmra.mxu0 %vm490_vm5, %v700_v59 }
 0x5de   : > { %v698_v60 = vpop.f32.mrf.mxu2 }
 0x641   : > { %v775_v61 = vpop.f32.mrf.mxu3 }
 0x642   : > { %v779_v62 = vpack.c.bf16 %v775_v61, %v775_v61  ;;  %v1160_v61 = vld [vmem:[%s1623_s10] sm:$0xff] }
 0x643   : > { %997 = vmatpush.bf16.msra.mxu1 %v1160_v61 }
 0x644   : > { %1109 = vmatmul.msk.bf16.vlgmr.msrb.gmra.mxu2 %vm490_vm5, %v779_v62 }
 0x646   : > { %v621_v63 = vpop.f32.mrf.mxu0 }
 0x647   : > { %v641_v3 = vadd.f32 %v1494_v14, %v621_v63 }
 0x649   : > { %v777_v1 = vpop.f32.mrf.mxu3 }
 0x64e   : > { %v623_v2 = vpop.f32.mrf.mxu0 }
 0x656   : > { %v718_v4 = vpop.f32.mrf.mxu0 }
 0x657   : > { %v722_v5 = vadd.f32 %v718_v4, %v641_v3 }
 0x65e   : > { %v720_v6 = vpop.f32.mrf.mxu0 }
 0x6c7   : > { %v797_v7 = vpop.f32.mrf.mxu2 }
 0x6c8   : > { %v801_v9 = vadd.f32 %v797_v7, %v722_v5 }
 0x6ca   : > { %v802_v11 = vadd.f32 %v801_v9, %v1444_v0  ;;  %v1159_v0 = vld [vmem:[%s1621_s8 + $0x8] sm:$0xff] }
 0x6cb   : > { %870 = vmatpush.bf16.msrb.mxu0 %v1159_v0 }
 0x6cc   : > { %v1528_v12 = vadd.f32 %v1221_v10, %v802_v11 }
 0x6ce   : > { %v810_v13 = vsel %vm413_vm0, %v1528_v12, 0.0 }
 0x6cf   : > { %v799_v15 = vpop.f32.mrf.mxu2  ;;  %811 = vadd.xlane.f32.xlu2 %v810_v13  ;;  %871 = vmatpush.bf16.msrb.mxu0 %v1158_v20 }
 0x742   : > { %v812_v16 = vpop.xlane.xlu2 %811 }
 0x743   : > { %v813_v14 = vmul.f32 %v812_v16, %v1448_v8 }
 0x745   : > { %v814_v17 = vsub.f32 %v1528_v12, %v813_v14 }
 0x747   : > { %v815_v18 = vmul.f32 %v814_v17, %v814_v17 }
 0x749   : > { %v816_v19 = vsel %vm413_vm0, %v815_v18, 0.0 }
 0x74a   : > { %817 = vadd.xlane.f32.xlu0 %v816_v19 }
 0x7bd   : > { %v818_v21 = vpop.xlane.xlu0 %817 }
 0x7be   : > { %v819_v22 = vmul.f32 %v818_v21, %v1448_v8  ;;  %v1223_v8 = vld [vmem:[%s1620_s7] ss:$0 sm:$0xff] }
 0x7c0   : > { %v820_v23 = vadd.f32 1e-05, %v819_v22 }
 0x7c2   : > { %1246 = vrsqrt.f32 %v820_v23  ;;  %vm827_vm8 = vweird.f32 %v820_v23 }
 0x7c8   : > { %v1247_v24 = vpop.eup %1246 }
 0x7c9   : > { %v822_v25 = vmul.f32 %v1247_v24, %v820_v23  ;;  %vm828_vm7 = vweird.f32 %v1247_v24 }
 0x7ca   : > { %vm829_vm9 = vmor %vm827_vm8, %vm828_vm7 }
 0x7cb   : > { %v823_v26 = vmul.f32 %v1247_v24, %v822_v25 }
 0x7cd   : > { %v824_v27 = vmul.f32 0.5, %v823_v26  ;;  %v1225_v26 = vld [vmem:[%s1624_s11] ss:$0 sm:$0xff] }
 0x7cf   : > { %v825_v28 = vsub.f32 1.5, %v824_v27 }
 0x7d1   : > { %v826_v29 = vmul.f32 %v1247_v24, %v825_v28 }
 0x7d3   : > { %v830_v31 = vsel %vm829_vm9, %v1247_v24, %v826_v29 }
 0x7d4   : > { %v831_v32 = vmul.f32 %v830_v31, %v814_v17 }
 0x7d6   : > { %v835_v34 = vmul.f32 %v1222_v30, %v831_v32 }
 0x7d8   : > { %v839_v35 = vadd.f32 %v1223_v8, %v835_v34 }
 0x7da   : > { %v840_v36 = vpack.c.bf16 %v839_v35, %v839_v35 }
 0x7dc   : > { %1118 = vmatmul.msk.bf16.vlgmr.msrb.gmra.mxu0 %vm413_vm0, %v840_v36 }
 0x859   : > { %v873_v40 = vpop.f32.mrf.mxu0 }
 0x85a   : > { %v874_v41 = vadd.f32 %v1224_v39, %v873_v40 }
 0x85c   : > { %v878_v42 = vmul.f32 0.70710677, %v874_v41  ;;  %v877_v22 = vmul.f32 0.5, %v874_v41 }
 0x85e   : > { %v879_v44 = vmul.f32 %v878_v42, %v878_v42 }
 0x860   : > { %v880_v45 = vmin.f32 %v879_v44, 16.0 }
 0x861   : > { %v875_v46 = vpop.f32.mrf.mxu0 }
 0x862   : > { %v881_v48 = vmul.f32 2.1237322e-06, %v880_v45  ;;  %v892_v49 = vmul.f32 3.8918573e-05, %v880_v45 }
 0x864   : > { %v882_v50 = vadd.f32 0.00028619796, %v881_v48  ;;  %v893_v51 = vadd.f32 0.001143296, %v892_v49 }
 0x866   : > { %v883_v53 = vmul.f32 %v882_v50, %v880_v45  ;;  %v894_v54 = vmul.f32 %v893_v51, %v880_v45 }
 0x868   : > { %v895_v55 = vadd.f32 0.014752088, %v894_v54  ;;  %v884_v56 = vadd.f32 0.0036580483, %v883_v53 }
 0x86a   : > { %v896_v58 = vmul.f32 %v895_v55, %v880_v45  ;;  %v885_v60 = vmul.f32 %v884_v56, %v880_v45 }
 0x86c   : > { %v897_v59 = vadd.f32 0.112945676, %v896_v58  ;;  %v886_v1 = vadd.f32 0.05243302, %v885_v60 }
 0x86e   : > { %v898_v62 = vmul.f32 %v897_v59, %v880_v45  ;;  %v887_v4 = vmul.f32 %v886_v1, %v880_v45 }
 0x870   : > { %v899_v63 = vadd.f32 0.4994258, %v898_v62  ;;  %v888_v5 = vadd.f32 0.18741608, %v887_v4 }
 0x872   : > { %v900_v2 = vmul.f32 %v899_v63, %v880_v45  ;;  %v889_v7 = vmul.f32 %v888_v5, %v880_v45 }
 0x874   : > { %v901_v3 = vadd.f32 1.0, %v900_v2  ;;  %v890_v13 = vadd.f32 1.1283791, %v889_v7 }
 0x876   : > { %1248 = vrcp.f32 %v901_v3  ;;  %v913_v11 = vand.u32 2147483648, %v901_v3  ;;  %v911_v16 = vand.u32 2147483647, %v901_v3  ;;  %vm907_vm11 = vweird.f32 %v901_v3 }
 0x877   : > { %v891_v18 = vmul.f32 %v890_v13, %v878_v42 }
 0x878   : > { %v914_v17 = vor.u32 1.1754944e-38, %v913_v11  ;;  %vm912_vm13 = vcmp.eq.f32.partialorder %v911_v16, 8.507059e+37 }
 0x87c   : > { %v1249_v6 = vpop.eup %1248 }
 0x87d   : > { %v903_v9 = vmul.f32 %v1249_v6, %v901_v3  ;;  %vm908_vm10 = vweird.f32 %v1249_v6 }
 0x87e   : > { %vm909_vm12 = vmor %vm907_vm11, %vm908_vm10 }
 0x87f   : > { %v904_v10 = vsub.f32 1.0, %v903_v9 }
 0x881   : > { %v905_v15 = vmul.f32 %v1249_v6, %v904_v10 }
 0x883   : > { %v906_v14 = vadd.f32 %v1249_v6, %v905_v15 }
 0x885   : > { %v910_v19 = vsel %vm909_vm12, %v1249_v6, %v906_v14 }
 0x886   : > { %v915_v0 = vsel %vm912_vm13, %v914_v17, %v910_v19 }
 0x887   : > { %v916_v20 = vmul.f32 %v915_v0, %v891_v18 }
 0x889   : > { %v1119_v21 = vclamps-f32 %v916_v20, 1.0 }
 0x88b   : > { %v919_v23 = vadd.f32 1.0, %v1119_v21 }
 0x88d   : > { %v920_v24 = vmul.f32 %v919_v23, %v877_v22 }
 0x88f   : > { %v921_v25 = vpack.c.bf16 %v920_v24, %v920_v24 }
 0x891   : > { %998 = vmatmul.bf16.vlgmr.msra.gmra.mxu1 %v921_v25 }
 0x90e   : > { %v999_v27 = vpop.f32.mrf.mxu1 }
 0x90f   : > { %v1000_v28 = vadd.f32 %v1225_v26, %v999_v27 }
 0x911   : > { %v1003_v29 = vadd.f32 %v1000_v28, %v1528_v12 }
 0x913   : > { %1004 = vst.msk [vmem:[%s404_s20] sm:$0xff] %vm413_vm0, %v1003_v29 }
 0x914   : > { %1277 = shalt.err (!%p1274_p3)
}
 0x915   : > { %1168 = dma.vmem_to_hbm [thread:$0]  (%p1429_p5), %s1019_s0, 128, %s1021_s1, %s1006_s25  }
 0x916   : > { %v1001_v12 = vpop.f32.mrf.mxu1 }
 0x917 PF: > { %p1174_p4 = scmp.ge.s32.totalorder %s1312_s24, 2  ;;  %s1032_s26 = sand.u32 1, %s1300_s21  }
 0x918   : > { %s1033_s19 = scalar_lea.sflag [#allocation3], %s1032_s26 }
 0x919   : > { %p1171_p7 = pnand %p1174_p4, %p1433_p6 }
 0x91b   : > { %p1172_p8 = pneg %p1171_p7 }
 0x91d   : > { %1295 = dma.done.wait (%p1172_p8), %s1033_s19, 128  }
 0x91e   : > { %1297 = vsyncadd (%p1172_p8), %s1033_s19, 4294967168  ;;  %p22_p9 = scmp.ge.s32.totalorder %s1416_s27, 4   ;;  %s1634_s21 = smov %s1304_s22 }
 0x91f   : > { %s1635_s22 = smov %s1308_s23  ;;  %s1636_s23 = smov %s1427_s30 }
 0x920   : > { %s1637_s24 = smov %s1416_s27  ;;  %24 = sbr.rel (!%p22_p9) target bundleno = 7 (0x7), region = 106 }
 0x925   :  { %1039 = vsyncpa [#allocation3], 1 }
 0x926   :  { %1041 = vsyncpa [#allocation3 + $0x1], 1 }

// kernel: tpu_custom_call.1
= control target key start
LH: loop header
LB: loop body
LE: loop exit
PB: predicated region body
PF: predicated region fallthrough
CT: control target
= control target key end

     0   :  { %s1613_s0 = inlined_call_operand.vmem [shape: f32[2,8,32], index: 0, kind: input, shape index: {}]   ;;  %s1614_s1 = inlined_call_operand.vmem [shape: f32[1,32], index: 1, kind: input, shape index: {}]   ;;  %s1615_s2 = inlined_call_operand.vmem [shape: f32[1,32], index: 2, kind: input, shape index: {}]   ;;  %s1616_s3 = inlined_call_operand.vmem [shape: bf16[32,96], index: 3, kind: input, shape index: {}]   ;;  %s1617_s4 = inlined_call_operand.vmem [shape: bf16[4,8,32], index: 4, kind: input, shape index: {}]   ;;  %s1618_s5 = inlined_call_operand.vmem [shape: f32[1,32], index: 5, kind: input, shape index: {}]   ;;  %s1619_s6 = inlined_call_operand.vmem [shape: f32[1,32], index: 6, kind: input, shape index: {}]   ;;  %s1620_s7 = inlined_call_operand.vmem [shape: f32[1,32], index: 7, kind: input, shape index: {}]   ;;  %s1621_s8 = inlined_call_operand.vmem [shape: bf16[32,128], index: 8, kind: input, shape index: {}]   ;;  %s1622_s9 = inlined_call_operand.vmem [shape: f32[1,128], index: 9, kind: input, shape index: {}]   ;;  %s1623_s10 = inlined_call_operand.vmem [shape: bf16[128,32], index: 10, kind: input, shape index: {}]   ;;  %s1624_s11 = inlined_call_operand.vmem [shape: f32[1,32], index: 11, kind: input, shape index: {}]   ;;  %s1625_s12 = inlined_call_operand.hbm [shape: f32[2,8,32], index: 12, kind: output, shape index: {}]  }
   0x1   :  { %1626 = sst [smem:[#allocation5_spill]] %s1613_s0 }
   0x2   :  { %1627 = sst [smem:[#allocation6_spill]] %s1614_s1 }
   0x3   :  { %1628 = sst [smem:[#allocation7_spill]] %s1615_s2 }
   0x4   :  { %17 = vsyncpa [#allocation3], 0 }
   0x5   :  { %19 = vsyncpa [#allocation3 + $0x1], 0  ;;  %s1391_s21 = smov 0   ;;  %s1393_s22 = smov 0  }
   0x6   :  { %s1395_s23 = smov 0   ;;  %s1397_s24 = smov 0  }
   0x7 LB: > { %s1412_s25 = sadd.s32 4294967295, %s1312_s24   ;;  %s1080_s26 = sadd.s32 4294967294, %s1312_s24   ;;  %s1312_s24 = sphi %s1397_s24, %s1637_s24   ;;  %s1308_s23 = sphi %s1395_s23, %s1636_s23   ;;  %s1304_s22 = sphi %s1393_s22, %s1635_s22   ;;  %s1300_s21 = sphi %s1391_s21, %s1634_s21  }
   0x8   : > { %s1416_s27 = sadd.s32 1, %s1312_s24   ;;  %s289_s28 = sadd.s32 1, %s1308_s23 }
   0x9   : > { %s286_s29 = ssub.s32 %s1312_s24, %s1416_s27  ;;  %p299_p0 = scmp.ne.s32.totalorder %s1308_s23, %s1304_s22 }
   0xa   : > { %p287_p1 = scmp.eq.s32.totalorder %s286_s29, 0  ;;  %p300_p2 = scmp.eq.s32.totalorder %s1412_s25, 1 }
   0xb   : > { %p305_p3 = scmp.ne.s32.totalorder %s1304_s22, %s1300_s21  ;;  %p306_p4 = scmp.eq.s32.totalorder %s1080_s26, 1 }
   0xc   : > { %s1427_s30 = scalar_select %p287_p1, %s1308_s23, %s289_s28  }
   0xd   : > { %p1429_p5 = por %p300_p2, %p299_p0  ;;  %p1433_p6 = por %p306_p4, %p305_p3 }
   0xe   : > { %p1083_p7 = scmp.ge.s32.totalorder %s1312_s24, 1  ;;  %p364_p8 = scmp.lt.s32.totalorder %s1312_s24, 3 }
  0x10   : > { %p365_p9 = pnand %p1083_p7, %p364_p8 }
  0x11   : > { %p405_p10 = scmp.lt.s32.totalorder (!%p365_p9), %s1412_s25, 1  ;;  %s1631_s0 = sld [smem:[#allocation5_spill]] (!%p365_p9) }
  0x12   : > { %368 = sbr.rel (%p365_p9) target bundleno = 2327 (0x917), region = 68  ;;  %s1632_s1 = sld [smem:[#allocation6_spill]] (!%p365_p9) }
  0x13   : > { %s1633_s2 = sld [smem:[#allocation7_spill]] (!%p365_p9)  ;;  %s1316_s20 = smov (!%p365_p9), 96  }
  0x14   : > { %s1317_s26 = smov (!%p365_p9), 80   ;;  %s1318_s28 = smov (!%p365_p9), 112  }
  0x15   : > { %s1319_s29 = smov (!%p365_p9), 64   ;;  %s1322_s17 = smov (!%p365_p9), 104  }
  0x17   : > { %s406_s15 = scalar_select %p405_p10, %s1412_s25, 1  ;;  %vm413_vm0 = vcmask 261120   ;;  %v1314_v2 = vmov 32.0   ;;  %v1157_v14 = vld [vmem:[%s1616_s3 + $0x8] sm:$0xff]  ;;  %v1156_v15 = vld [vmem:[%s1616_s3] sm:$0xff]  ;;  %vm490_vm5 = vcmask 64512  }
  0x18   : > { %1226 = vrcp.f32 %v1314_v2  ;;  %477 = vmatpush.bf16.msra.mxu0 %v1157_v14  ;;  %v1219_v25 = vld [vmem:[%s1632_s1] ss:$0 sm:$0xff]  ;;  %vm527_vm6 = vcmask 1043456  }
  0x19   : > { %s1085_s16 = sshll.u32 %s406_s15, 3  ;;  %v1220_v28 = vld [vmem:[%s1633_s2] ss:$0 sm:$0xff]  ;;  %s1320_s15 = smov 120  }
  0x1a   : > { %s408_s19 = scalar_lea.vmem %s1631_s0, %s1085_s16  ;;  %s1321_s16 = smov 72   ;;  %v545_v51 = vld [vmem:[%s1617_s4] sm:$0xf] }
  0x1b   : > { %v1444_v0 = vld [vmem:[%s408_s19] sm:$0xff]  ;;  %s1315_s19 = smov 88   ;;  %v629_v52 = vsel %vm527_vm6, %v545_v51, 0 }
  0x1c   : > { %v414_v1 = vsel %vm413_vm0, %v1444_v0, 0.0  ;;  %478 = vmatpush.bf16.msra.mxu0 %v1156_v15  ;;  %638 = vmatpush.bf16.msra.mxu1 %v629_v52 }
  0x1d   : > { %415 = vadd.xlane.f32.xlu0 %v414_v1 }
  0x1e   : > { %v1227_v3 = vpop.eup %1226 }
  0x1f   : > { %v418_v4 = vmul.f32 32.0, %v1227_v3  ;;  %vm422_vm1 = vweird.f32 %v1227_v3 }
  0x21   : > { %v419_v5 = vsub.f32 1.0, %v418_v4 }
  0x23   : > { %v420_v6 = vmul.f32 %v1227_v3, %v419_v5 }
  0x25   : > { %v421_v7 = vadd.f32 %v1227_v3, %v420_v6 }
  0x27   : > { %v1448_v8 = vsel %vm422_vm1, %v1227_v3, %v421_v7 }
  0x90   : > { %v416_v9 = vpop.xlane.xlu0 %415 }
  0x91   : > { %v424_v10 = vmul.f32 %v1448_v8, %v416_v9 }
  0x93   : > { %v425_v11 = vsub.f32 %v1444_v0, %v424_v10 }
  0x95   : > { %v426_v12 = vmul.f32 %v425_v11, %v425_v11 }
  0x97   : > { %v427_v13 = vsel %vm413_vm0, %v426_v12, 0.0 }
  0x98   : > { %428 = vadd.xlane.f32.xlu0 %v427_v13 }
 0x10b   : > { %v429_v16 = vpop.xlane.xlu0 %428 }
 0x10c   : > { %v430_v17 = vmul.f32 %v429_v16, %v1448_v8 }
 0x10e   : > { %v431_v18 = vadd.f32 1e-05, %v430_v17 }
 0x110   : > { %1228 = vrsqrt.f32 %v431_v18  ;;  %vm438_vm3 = vweird.f32 %v431_v18 }
 0x116   : > { %v1229_v19 = vpop.eup %1228 }
 0x117   : > { %v433_v20 = vmul.f32 %v1229_v19, %v431_v18  ;;  %vm439_vm2 = vweird.f32 %v1229_v19 }
 0x118   : > { %vm440_vm4 = vmor %vm438_vm3, %vm439_vm2 }
 0x119   : > { %v434_v21 = vmul.f32 %v1229_v19, %v433_v20 }
 0x11b   : > { %v435_v22 = vmul.f32 0.5, %v434_v21 }
 0x11d   : > { %v436_v23 = vsub.f32 1.5, %v435_v22 }
 0x11f   : > { %v437_v24 = vmul.f32 %v1229_v19, %v436_v23 }
 0x121   : > { %v441_v26 = vsel %vm440_vm4, %v1229_v19, %v437_v24 }
 0x122   : > { %v442_v27 = vmul.f32 %v441_v26, %v425_v11 }
 0x124   : > { %v446_v29 = vmul.f32 %v1219_v25, %v442_v27 }
 0x126   : > { %v450_v30 = vadd.f32 %v1220_v28, %v446_v29 }
 0x128   : > { %v451_v31 = vpack.c.bf16 %v450_v30, %v450_v30 }
 0x12a   : > { %1094 = vmatmul.msk.bf16.vlgmr.msra.gmra.mxu0 %vm413_vm0, %v451_v31 }
 0x1a7   : > { %v480_v32 = vpop.f32.mrf.mxu0 }
 0x1a8   : > { %v1467_v33 = vpack.c.bf16 %v480_v32, %v480_v32  ;;  %v484_v35 = vmul.f32 0.35355338, %v480_v32 }
 0x1aa   : > { %549 = vrot.lane.b32.xlu0 %v1467_v33, %s1315_s19  ;;  %488 = vrot.lane.b32.xlu1 %v1467_v33, %s1316_s20  ;;  %v485_v36 = vpack.c.bf16 %v484_v35, %v484_v35  ;;  %s1323_s20 = smov 40  }
 0x1af   : > { %v482_v34 = vpop.f32.mrf.mxu0 }
 0x1b2   : > { %646 = vrot.lane.b32.xlu0 %v1467_v33, %s1317_s26  ;;  %s1324_s26 = smov 56  }
 0x1ba   : > { %644 = vrot.lane.b32.xlu0 %v485_v36, %s1318_s28  ;;  %s1325_s28 = smov 48  }
 0x21c   : > { %v550_v37 = vpop.permute.xlu0 %549  ;;  %v489_v38 = vpop.permute.xlu1 %488 }
 0x21d   : > { %v495_v39 = vsel %vm490_vm5, %v489_v38, 0  ;;  %v555_v40 = vsel %vm490_vm5, %v550_v37, 0 }
 0x21e   : > { %504 = vmatpush.bf16.xpose.msra.mxu3 %v495_v39 }
 0x224   : > { %v647_v41 = vpop.permute.xlu0 %646 }
 0x225   : > { %v652_v42 = vsel %vm490_vm5, %v647_v41, 0  ;;  %1095 = vmatmul.msk.bf16.vlgmr.msra.gmra.mxu3 %vm490_vm5, %v485_v36 }
 0x226   : > { %564 = vmatpush.bf16.xpose.msrb.mxu3 %v555_v40 }
 0x22c   : > { %v645_v62 = vpop.permute.xlu0 %644 }
 0x22e   : > { %661 = vmatpush.bf16.xpose.msra.mxu3 %v652_v42 }
 0x2a8   : > { %v506_v43 = vpop.f32.mrf.mxu3 }
 0x2a9   : > { %v510_v44 = vsel %vm490_vm5, %v506_v43, -inf }
 0x2aa   : > { %511 = vmax.xlane.f32.xlu1 %v510_v44 }
 0x2b0   : > { %v508_v45 = vpop.f32.mrf.mxu3 }
 0x2b1   : > { %v1099_v45 = vld [vmem:[%s1617_s4 + $0x4] sm:$0xf] }
 0x31d   : > { %v512_v46 = vpop.xlane.xlu1 %511 }
 0x31e   : > { %v513_v47 = vsub.f32 %v506_v43, %v512_v46  ;;  %v610_v46 = vsel %vm527_vm6, %v1099_v45, 0 }
 0x31f   : > { %619 = vmatpush.bf16.msrb.mxu0 %v610_v46 }
 0x320   : > { %v514_v48 = vmul.f32 1.442695, %v513_v47 }
 0x322   : > { %1230 = vpow2.f32 %v514_v48  ;;  %v1104_v48 = vld [vmem:[%s1617_s4 + $0x8] sm:$0xf] }
 0x328   : > { %v1231_v49 = vpop.eup %1230 }
 0x329   : > { %v516_v50 = vsel %vm490_vm5, %v1231_v49, 0.0 }
 0x32a   : > { %517 = vadd.xlane.f32.xlu2 %v516_v50 }
 0x342   : > { %522 = vrot.lane.b32.xlu2 %v1467_v33, %s1319_s29  ;;  %s1153_s29 = sshll.u32 %s1412_s25, 3 }
 0x343   : > { %s1016_s19 = scalar_lea.hbm %s1625_s12, %s1153_s29 }
 0x344   : > { %s1020_s1 = sshll.u32 %s1016_s19, 4  ;;  %s1021_s1 = int_to_ptr.hbm [resolvable:$true] %s1020_s1 }
 0x345   : > { %s1264_s2 = sshra.s32 %s1021_s1, 4  ;;  %s1265_s2 = int_to_ptr.hbm [resolvable:$true] %s1264_s2 }
 0x346   : > { %p1271_p0 = scmp.lt.s32.totalorder %s1265_s2, %s1625_s12 }
 0x34a   : > { %547 = vrot.lane.b32.xlu2 %v485_v36, %s1320_s15  ;;  %s1266_s15 = scalar_lea.hbm %s1265_s2, 8 }
 0x34b   : > { %p1267_p11 = scmp.ne.s32.totalorder %s1265_s2, %s1266_s15 }
 0x34d   : > { %p1268_p12 = pnand %p1267_p11, %p1429_p5 }
 0x34f   : > { %p1269_p13 = pneg %p1268_p12 }
 0x352   : > { %725 = vrot.lane.b32.xlu2 %v1467_v33, %s1321_s16 }
 0x35a   : > { %723 = vrot.lane.b32.xlu2 %v485_v36, %s1322_s17 }
 0x39d   : > { %v518_v53 = vpop.xlane.xlu2 %517 }
 0x39e   : > { %1232 = vrcp.f32 %v518_v53  ;;  %v1108_v53 = vld [vmem:[%s1617_s4 + $0xc] sm:$0xf] }
 0x3a4   : > { %v1233_v54 = vpop.eup %1232 }
 0x3a5   : > { %v523_v55 = vpop.permute.xlu2 %522  ;;  %v520_v56 = vmul.f32 %v1233_v54, %v1231_v49  ;;  %v707_v49 = vsel %vm527_vm6, %v1104_v48, 0  ;;  %v786_v54 = vsel %vm527_vm6, %v1108_v53, 0 }
 0x3a6   : > { %v529_v57 = vsel %vm527_vm6, %v523_v55, 0  ;;  %716 = vmatpush.bf16.msra.mxu0 %v707_v49 }
 0x3a7   : > { %538 = vmatpush.bf16.msra.mxu2 %v529_v57  ;;  %v521_v58 = vpack.c.bf16 %v520_v56, %v520_v56 }
 0x3aa   : > { %1096 = vmatmul.msk.bf16.vlgmr.msra.gmra.mxu2 %vm490_vm5, %v521_v58 }
 0x3ad   : > { %v548_v59 = vpop.permute.xlu2 %547 }
 0x3ae   : > { %1097 = vmatmul.msk.bf16.vlgmr.msrb.gmra.mxu3 %vm490_vm5, %v548_v59 }
 0x3b5   : > { %v726_v60 = vpop.permute.xlu2 %725 }
 0x3b6   : > { %v731_v61 = vsel %vm490_vm5, %v726_v60, 0 }
 0x3b7   : > { %740 = vmatpush.bf16.xpose.msrb.mxu1 %v731_v61 }
 0x3bd   : > { %v724_v6 = vpop.permute.xlu2 %723 }
 0x3be   : > { %1102 = vmatmul.msk.bf16.vlgmr.msra.gmra.mxu3 %vm490_vm5, %v645_v62 }
 0x42d   : > { %v540_v63 = vpop.f32.mrf.mxu2 }
 0x42e   : > { %v544_v1 = vpack.c.bf16 %v540_v63, %v540_v63 }
 0x430   : > { %1101 = vmatmul.msk.bf16.vlgmr.msra.gmra.mxu1 %vm490_vm5, %v544_v1 }
 0x431   : > { %v566_v2 = vpop.f32.mrf.mxu3 }
 0x432   : > { %v570_v3 = vsel %vm490_vm5, %v566_v2, -inf }
 0x433   : > { %571 = vmax.xlane.f32.xlu1 %v570_v3 }
 0x435   : > { %v542_v4 = vpop.f32.mrf.mxu2 }
 0x439   : > { %v568_v5 = vpop.f32.mrf.mxu3 }
 0x440   : > { %1106 = vmatmul.msk.bf16.vlgmr.msrb.gmra.mxu1 %vm490_vm5, %v724_v6 }
 0x441   : > { %v663_v7 = vpop.f32.mrf.mxu3 }
 0x442   : > { %v667_v9 = vsel %vm490_vm5, %v663_v7, -inf }
 0x443   : > { %668 = vmax.xlane.f32.xlu2 %v667_v9 }
 0x449   : > { %v665_v10 = vpop.f32.mrf.mxu3 }
 0x44a   : > { %v1221_v10 = vld [vmem:[%s1618_s5] ss:$0 sm:$0xff] }
 0x45b   : > { %758 = vrot.lane.b32.xlu2 %v1467_v33, %s1323_s20 }
 0x4a6   : > { %v572_v11 = vpop.xlane.xlu1 %571 }
 0x4a7   : > { %v573_v12 = vsub.f32 %v566_v2, %v572_v11 }
 0x4a9   : > { %v574_v13 = vmul.f32 1.442695, %v573_v12 }
 0x4ab   : > { %1234 = vpow2.f32 %v574_v13 }
 0x4ad   : > { %v1494_v14 = vpop.f32.mrf.mxu1 }
 0x4b1   : > { %v1235_v15 = vpop.eup %1234 }
 0x4b2   : > { %v576_v16 = vsel %vm490_vm5, %v1235_v15, 0.0 }
 0x4b3   : > { %577 = vadd.xlane.f32.xlu1 %v576_v16 }
 0x4b5   : > { %v642_v17 = vpop.f32.mrf.mxu1 }
 0x4b6   : > { %v669_v18 = vpop.xlane.xlu2 %668 }
 0x4b7   : > { %v670_v19 = vsub.f32 %v663_v7, %v669_v18 }
 0x4b9   : > { %v671_v20 = vmul.f32 1.442695, %v670_v19 }
 0x4bb   : > { %1236 = vpow2.f32 %v671_v20  ;;  %v1158_v20 = vld [vmem:[%s1621_s8] sm:$0xff] }
 0x4bd   : > { %v742_v21 = vpop.f32.mrf.mxu1 }
 0x4be   : > { %v759_v22 = vpop.permute.xlu2 %758  ;;  %v746_v23 = vsel %vm490_vm5, %v742_v21, -inf }
 0x4bf   : > { %v764_v24 = vsel %vm527_vm6, %v759_v22, 0  ;;  %747 = vmax.xlane.f32.xlu0 %v746_v23 }
 0x4c0   : > { %773 = vmatpush.bf16.msrb.mxu3 %v764_v24 }
 0x4c1   : > { %v1237_v25 = vpop.eup %1236 }
 0x4c2   : > { %v673_v27 = vsel %vm490_vm5, %v1237_v25, 0.0 }
 0x4c5   : > { %v744_v26 = vpop.f32.mrf.mxu1 }
 0x4c7   : > { %674 = vadd.xlane.f32.xlu0 %v673_v27 }
 0x4cc   : > { %582 = vrot.lane.b32.xlu1 %v1467_v33, %s1324_s26  ;;  %s402_s26 = sand.u32 1, %s1304_s22  }
 0x4cd   : > { %s1006_s25 = scalar_lea.sflag [#allocation3], %s402_s26 }
 0x4db   : > { %679 = vrot.lane.b32.xlu0 %v1467_v33, %s1325_s28  ;;  %s1084_s28 = sshll.u32 %s402_s26, 3 }
 0x4dc   : > { %s404_s20 = scalar_lea.vmem [#allocation2], %s1084_s28  ;;  %s1270_s28 = scalar_lea.hbm %s1625_s12, 16 }
 0x4dd   : > { %s1018_s0 = sshll.u32 %s404_s20, 4  ;;  %p1272_p1 = scmp.lt.s32.totalorder %s1270_s28, %s1266_s15  ;;  %s1019_s0 = int_to_ptr.vmem [resolvable:$true] %s1018_s0 }
 0x4df   : > { %p1273_p2 = por %p1272_p1, %p1271_p0 }
 0x4e1   : > { %p1274_p3 = pnand %p1273_p2, %p1269_p13 }
 0x526   : > { %v578_v28 = vpop.xlane.xlu1 %577 }
 0x527   : > { %1238 = vrcp.f32 %v578_v28 }
 0x52d   : > { %v1239_v32 = vpop.eup %1238 }
 0x52e   : > { %v580_v35 = vmul.f32 %v1239_v32, %v1235_v15 }
 0x530   : > { %v581_v40 = vpack.c.bf16 %v580_v35, %v580_v35 }
 0x532   : > { %v748_v29 = vpop.xlane.xlu0 %747 }
 0x533   : > { %v749_v30 = vsub.f32 %v742_v21, %v748_v29 }
 0x535   : > { %v750_v31 = vmul.f32 1.442695, %v749_v30  ;;  %v1222_v30 = vld [vmem:[%s1619_s6] ss:$0 sm:$0xff] }
 0x537   : > { %1240 = vpow2.f32 %v750_v31 }
 0x53a   : > { %v675_v39 = vpop.xlane.xlu0 %674 }
 0x53b   : > { %1242 = vrcp.f32 %v675_v39  ;;  %v1224_v39 = vld [vmem:[%s1622_s9] ss:$0 sm:$0xff] }
 0x53d   : > { %v1241_v34 = vpop.eup %1240 }
 0x53e   : > { %v583_v36 = vpop.permute.xlu1 %582  ;;  %v752_v37 = vsel %vm490_vm5, %v1241_v34, 0.0 }
 0x53f   : > { %753 = vadd.xlane.f32.xlu1 %v752_v37  ;;  %v588_v38 = vsel %vm527_vm6, %v583_v36, 0  ;;  %v1167_v37 = vld [vmem:[%s1623_s10 + $0x38] sm:$0xff] }
 0x540   : > { %597 = vmatpush.bf16.msrb.mxu2 %v588_v38  ;;  %990 = vmatpush.bf16.msra.mxu1 %v1167_v37  ;;  %v1166_v38 = vld [vmem:[%s1623_s10 + $0x30] sm:$0xff] }
 0x541   : > { %v1243_v33 = vpop.eup %1242 }
 0x542   : > { %v677_v41 = vmul.f32 %v1243_v33, %v1237_v25  ;;  %v1165_v33 = vld [vmem:[%s1623_s10 + $0x28] sm:$0xff] }
 0x543   : > { %1098 = vmatmul.msk.bf16.vlgmr.msrb.gmra.mxu2 %vm490_vm5, %v581_v40 }
 0x544   : > { %v678_v44 = vpack.c.bf16 %v677_v41, %v677_v41  ;;  %991 = vmatpush.bf16.msra.mxu1 %v1166_v38 }
 0x548   : > { %992 = vmatpush.bf16.msra.mxu1 %v1165_v33 }
 0x54d   : > { %v680_v42 = vpop.permute.xlu0 %679 }
 0x54e   : > { %v685_v43 = vsel %vm527_vm6, %v680_v42, 0 }
 0x54f   : > { %694 = vmatpush.bf16.msra.mxu2 %v685_v43  ;;  %v1164_v43 = vld [vmem:[%s1623_s10 + $0x20] sm:$0xff] }
 0x550   : > { %993 = vmatpush.bf16.msra.mxu1 %v1164_v43 }
 0x553   : > { %1103 = vmatmul.msk.bf16.vlgmr.msra.gmra.mxu2 %vm490_vm5, %v678_v44 }
 0x554   : > { %795 = vmatpush.bf16.msrb.mxu2 %v786_v54 }
 0x5b2   : > { %v754_v47 = vpop.xlane.xlu1 %753 }
 0x5b3   : > { %1244 = vrcp.f32 %v754_v47  ;;  %v1163_v47 = vld [vmem:[%s1623_s10 + $0x18] sm:$0xff] }
 0x5b4   : > { %994 = vmatpush.bf16.msra.mxu1 %v1163_v47 }
 0x5b9   : > { %v1245_v50 = vpop.eup %1244 }
 0x5ba   : > { %v756_v51 = vmul.f32 %v1245_v50, %v1241_v34 }
 0x5bc   : > { %v757_v52 = vpack.c.bf16 %v756_v51, %v756_v51 }
 0x5be   : > { %1107 = vmatmul.msk.bf16.vlgmr.msrb.gmra.mxu3 %vm490_vm5, %v757_v52  ;;  %v1162_v52 = vld [vmem:[%s1623_s10 + $0x10] sm:$0xff] }
 0x5bf   : > { %995 = vmatpush.bf16.msra.mxu1 %v1162_v52 }
 0x5c6   : > { %v599_v55 = vpop.f32.mrf.mxu2 }
 0x5c7   : > { %v603_v56 = vpack.c.bf16 %v599_v55, %v599_v55 }
 0x5c9   : > { %1100 = vmatmul.msk.bf16.vlgmr.msrb.gmra.mxu0 %vm490_vm5, %v603_v56 }
 0x5ce   : > { %v601_v57 = vpop.f32.mrf.mxu2 }
 0x5cf   : > { %v1161_v57 = vld [vmem:[%s1623_s10 + $0x8] sm:$0xff] }
 0x5d0   : > { %996 = vmatpush.bf16.msra.mxu1 %v1161_v57 }
 0x5d6   : > { %v696_v58 = vpop.f32.mrf.mxu2 }
 0x5d7   : > { %v700_v59 = vpack.c.bf16 %v696_v58, %v696_v58 }
 0x5d9   : > { %1105 = vmatmul.msk.bf16.vlgmr.msra.gmra.mxu0 %vm490_vm5, %v700_v59 }
 0x5de   : > { %v698_v60 = vpop.f32.mrf.mxu2 }
 0x641   : > { %v775_v61 = vpop.f32.mrf.mxu3 }
 0x642   : > { %v779_v62 = vpack.c.bf16 %v775_v61, %v775_v61  ;;  %v1160_v61 = vld [vmem:[%s1623_s10] sm:$0xff] }
 0x643   : > { %997 = vmatpush.bf16.msra.mxu1 %v1160_v61 }
 0x644   : > { %1109 = vmatmul.msk.bf16.vlgmr.msrb.gmra.mxu2 %vm490_vm5, %v779_v62 }
 0x646   : > { %v621_v63 = vpop.f32.mrf.mxu0 }
 0x647   : > { %v641_v3 = vadd.f32 %v1494_v14, %v621_v63 }
 0x649   : > { %v777_v1 = vpop.f32.mrf.mxu3 }
 0x64e   : > { %v623_v2 = vpop.f32.mrf.mxu0 }
 0x656   : > { %v718_v4 = vpop.f32.mrf.mxu0 }
 0x657   : > { %v722_v5 = vadd.f32 %v718_v4, %v641_v3 }
 0x65e   : > { %v720_v6 = vpop.f32.mrf.mxu0 }
 0x6c7   : > { %v797_v7 = vpop.f32.mrf.mxu2 }
 0x6c8   : > { %v801_v9 = vadd.f32 %v797_v7, %v722_v5 }
 0x6ca   : > { %v802_v11 = vadd.f32 %v801_v9, %v1444_v0  ;;  %v1159_v0 = vld [vmem:[%s1621_s8 + $0x8] sm:$0xff] }
 0x6cb   : > { %870 = vmatpush.bf16.msrb.mxu0 %v1159_v0 }
 0x6cc   : > { %v1528_v12 = vadd.f32 %v1221_v10, %v802_v11 }
 0x6ce   : > { %v810_v13 = vsel %vm413_vm0, %v1528_v12, 0.0 }
 0x6cf   : > { %v799_v15 = vpop.f32.mrf.mxu2  ;;  %811 = vadd.xlane.f32.xlu2 %v810_v13  ;;  %871 = vmatpush.bf16.msrb.mxu0 %v1158_v20 }
 0x742   : > { %v812_v16 = vpop.xlane.xlu2 %811 }
 0x743   : > { %v813_v14 = vmul.f32 %v812_v16, %v1448_v8 }
 0x745   : > { %v814_v17 = vsub.f32 %v1528_v12, %v813_v14 }
 0x747   : > { %v815_v18 = vmul.f32 %v814_v17, %v814_v17 }
 0x749   : > { %v816_v19 = vsel %vm413_vm0, %v815_v18, 0.0 }
 0x74a   : > { %817 = vadd.xlane.f32.xlu0 %v816_v19 }
 0x7bd   : > { %v818_v21 = vpop.xlane.xlu0 %817 }
 0x7be   : > { %v819_v22 = vmul.f32 %v818_v21, %v1448_v8  ;;  %v1223_v8 = vld [vmem:[%s1620_s7] ss:$0 sm:$0xff] }
 0x7c0   : > { %v820_v23 = vadd.f32 1e-05, %v819_v22 }
 0x7c2   : > { %1246 = vrsqrt.f32 %v820_v23  ;;  %vm827_vm8 = vweird.f32 %v820_v23 }
 0x7c8   : > { %v1247_v24 = vpop.eup %1246 }
 0x7c9   : > { %v822_v25 = vmul.f32 %v1247_v24, %v820_v23  ;;  %vm828_vm7 = vweird.f32 %v1247_v24 }
 0x7ca   : > { %vm829_vm9 = vmor %vm827_vm8, %vm828_vm7 }
 0x7cb   : > { %v823_v26 = vmul.f32 %v1247_v24, %v822_v25 }
 0x7cd   : > { %v824_v27 = vmul.f32 0.5, %v823_v26  ;;  %v1225_v26 = vld [vmem:[%s1624_s11] ss:$0 sm:$0xff] }
 0x7cf   : > { %v825_v28 = vsub.f32 1.5, %v824_v27 }
 0x7d1   : > { %v826_v29 = vmul.f32 %v1247_v24, %v825_v28 }
 0x7d3   : > { %v830_v31 = vsel %vm829_vm9, %v1247_v24, %v826_v29 }
 0x7d4   : > { %v831_v32 = vmul.f32 %v830_v31, %v814_v17 }
 0x7d6   : > { %v835_v34 = vmul.f32 %v1222_v30, %v831_v32 }
 0x7d8   : > { %v839_v35 = vadd.f32 %v1223_v8, %v835_v34 }
 0x7da   : > { %v840_v36 = vpack.c.bf16 %v839_v35, %v839_v35 }
 0x7dc   : > { %1118 = vmatmul.msk.bf16.vlgmr.msrb.gmra.mxu0 %vm413_vm0, %v840_v36 }
 0x859   : > { %v873_v40 = vpop.f32.mrf.mxu0 }
 0x85a   : > { %v874_v41 = vadd.f32 %v1224_v39, %v873_v40 }
 0x85c   : > { %v878_v42 = vmul.f32 0.70710677, %v874_v41  ;;  %v877_v22 = vmul.f32 0.5, %v874_v41 }
 0x85e   : > { %v879_v44 = vmul.f32 %v878_v42, %v878_v42 }
 0x860   : > { %v880_v45 = vmin.f32 %v879_v44, 16.0 }
 0x861   : > { %v875_v46 = vpop.f32.mrf.mxu0 }
 0x862   : > { %v881_v48 = vmul.f32 2.1237322e-06, %v880_v45  ;;  %v892_v49 = vmul.f32 3.8918573e-05, %v880_v45 }
 0x864   : > { %v882_v50 = vadd.f32 0.00028619796, %v881_v48  ;;  %v893_v51 = vadd.f32 0.001143296, %v892_v49 }
 0x866   : > { %v883_v53 = vmul.f32 %v882_v50, %v880_v45  ;;  %v894_v54 = vmul.f32 %v893_v51, %v880_v45 }
 0x868   : > { %v895_v55 = vadd.f32 0.014752088, %v894_v54  ;;  %v884_v56 = vadd.f32 0.0036580483, %v883_v53 }
 0x86a   : > { %v896_v58 = vmul.f32 %v895_v55, %v880_v45  ;;  %v885_v60 = vmul.f32 %v884_v56, %v880_v45 }
 0x86c   : > { %v897_v59 = vadd.f32 0.112945676, %v896_v58  ;;  %v886_v1 = vadd.f32 0.05243302, %v885_v60 }
 0x86e   : > { %v898_v62 = vmul.f32 %v897_v59, %v880_v45  ;;  %v887_v4 = vmul.f32 %v886_v1, %v880_v45 }
 0x870   : > { %v899_v63 = vadd.f32 0.4994258, %v898_v62  ;;  %v888_v5 = vadd.f32 0.18741608, %v887_v4 }
 0x872   : > { %v900_v2 = vmul.f32 %v899_v63, %v880_v45  ;;  %v889_v7 = vmul.f32 %v888_v5, %v880_v45 }
 0x874   : > { %v901_v3 = vadd.f32 1.0, %v900_v2  ;;  %v890_v13 = vadd.f32 1.1283791, %v889_v7 }
 0x876   : > { %1248 = vrcp.f32 %v901_v3  ;;  %v913_v11 = vand.u32 2147483648, %v901_v3  ;;  %v911_v16 = vand.u32 2147483647, %v901_v3  ;;  %vm907_vm11 = vweird.f32 %v901_v3 }
 0x877   : > { %v891_v18 = vmul.f32 %v890_v13, %v878_v42 }
 0x878   : > { %v914_v17 = vor.u32 1.1754944e-38, %v913_v11  ;;  %vm912_vm13 = vcmp.eq.f32.partialorder %v911_v16, 8.507059e+37 }
 0x87c   : > { %v1249_v6 = vpop.eup %1248 }
 0x87d   : > { %v903_v9 = vmul.f32 %v1249_v6, %v901_v3  ;;  %vm908_vm10 = vweird.f32 %v1249_v6 }
 0x87e   : > { %vm909_vm12 = vmor %vm907_vm11, %vm908_vm10 }
 0x87f   : > { %v904_v10 = vsub.f32 1.0, %v903_v9 }
 0x881   : > { %v905_v15 = vmul.f32 %v1249_v6, %v904_v10 }
 0x883   : > { %v906_v14 = vadd.f32 %v1249_v6, %v905_v15 }
 0x885   : > { %v910_v19 = vsel %vm909_vm12, %v1249_v6, %v906_v14 }
 0x886   : > { %v915_v0 = vsel %vm912_vm13, %v914_v17, %v910_v19 }
 0x887   : > { %v916_v20 = vmul.f32 %v915_v0, %v891_v18 }
 0x889   : > { %v1119_v21 = vclamps-f32 %v916_v20, 1.0 }
 0x88b   : > { %v919_v23 = vadd.f32 1.0, %v1119_v21 }
 0x88d   : > { %v920_v24 = vmul.f32 %v919_v23, %v877_v22 }
 0x88f   : > { %v921_v25 = vpack.c.bf16 %v920_v24, %v920_v24 }
 0x891   : > { %998 = vmatmul.bf16.vlgmr.msra.gmra.mxu1 %v921_v25 }
 0x90e   : > { %v999_v27 = vpop.f32.mrf.mxu1 }
 0x90f   : > { %v1000_v28 = vadd.f32 %v1225_v26, %v999_v27 }
 0x911   : > { %v1003_v29 = vadd.f32 %v1000_v28, %v1528_v12 }
 0x913   : > { %1004 = vst.msk [vmem:[%s404_s20] sm:$0xff] %vm413_vm0, %v1003_v29 }
 0x914   : > { %1277 = shalt.err (!%p1274_p3)
}
 0x915   : > { %1168 = dma.vmem_to_hbm [thread:$0]  (%p1429_p5), %s1019_s0, 128, %s1021_s1, %s1006_s25  }
 0x916   : > { %v1001_v12 = vpop.f32.mrf.mxu1 }
 0x917 PF: > { %p1174_p4 = scmp.ge.s32.totalorder %s1312_s24, 2  ;;  %s1032_s26 = sand.u32 1, %s1300_s21  }
 0x918   : > { %s1033_s19 = scalar_lea.sflag [#allocation3], %s1032_s26 }
 0x919   : > { %p1171_p7 = pnand %p1174_p4, %p1433_p6 }
 0x91b   : > { %p1172_p8 = pneg %p1171_p7 }
 0x91d   : > { %1295 = dma.done.wait (%p1172_p8), %s1033_s19, 128  }
 0x91e   : > { %1297 = vsyncadd (%p1172_p8), %s1033_s19, 4294967168  ;;  %p22_p9 = scmp.ge.s32.totalorder %s1416_s27, 4   ;;  %s1634_s21 = smov %s1304_s22 }
 0x91f   : > { %s1635_s22 = smov %s1308_s23  ;;  %s1636_s23 = smov %s1427_s30 }
 0x920   : > { %s1637_s24 = smov %s1416_s27  ;;  %24 = sbr.rel (!%p22_p9) target bundleno = 7 (0x7), region = 106 }
 0x925   :  { %1039 = vsyncpa [#allocation3], 1 }
 0x926   :  { %1041 = vsyncpa [#allocation3 + $0x1], 1 }

</bundles_post_ra>
